<compile_context>
chip_gen: v6e
topology: v6e:2x2x1
jax: 0.10.0
libtpu: 0.0.40
codegen_flags: <defaults>
</compile_context>

<pallas_src>
import functools
import math

import jax
import jax.numpy as jnp
from jax import lax
from jax.experimental import pallas as pl
from jax.experimental.pallas import tpu as pltpu


# --------------------------------------------------------------------------- #
# Pallas kernel: fused bidirectional masked LSTM, final hidden states only.
# --------------------------------------------------------------------------- #
def bilstm_kernel(x_ref, len_ref, wih_ref, whh_ref, b_ref, out_ref, *scratch,
                  seq_len, hidden, fori_unroll):
    T, H = seq_len, hidden
    Bb = out_ref.shape[0]                      # batch block (multiple of 8 sublanes)
    E = x_ref.shape[-1]

    # ---- hoisted input projection: one big MXU matmul for both directions ----
    # (T, Bb, E) -> (T*Bb, E): Bb is a multiple of the sublane tile, so this leading-dim
    # collapse is layout-trivial. bf16 x / W_ih with f32 accumulation; bias folded in once.
    x2d = x_ref[...].reshape(T * Bb, E)
    xproj = (jnp.dot(x2d, wih_ref[...], preferred_element_type=jnp.float32)
             + b_ref[...])                     # (T*Bb, 8H) f32

    lens = len_ref[...]                        # (Bb, 1) int32 per-row valid lengths

    # static lane mask over the interleaved gate columns [i_f,i_b,f_f,f_b,o_f,o_b,g_f,g_b]
    # (compare chain only -- no vector int div/mod), hoisted out of the recurrence.
    col8 = lax.broadcasted_iota(jnp.int32, (1, 8 * H), 1)
    bwd_lanes = (((col8 >= H) & (col8 < 2 * H)) |
                 ((col8 >= 3 * H) & (col8 < 4 * H)) |
                 ((col8 >= 5 * H) & (col8 < 6 * H)) |
                 (col8 >= 7 * H))

    # per-lane validity window over the loop index t (hoisted):
    #   fwd half of the state: valid iff t < len            -> window [0, len)
    #   bwd half: processes time T-1-t, valid iff T-1-t<len -> window [T-len, T)
    is_bwd_half = lax.broadcasted_iota(jnp.int32, (1, 2 * H), 1) >= H
    lower = jnp.where(is_bwd_half, T - lens, 0)              # (Bb, 2H)
    upper = jnp.where(is_bwd_half, T, lens)

    whh = whh_ref[...]                         # (2H, 8H) block-sparse recurrent weights

    def step(t, pre_f, pre_b, hc, cc):
        # Fused fwd/bwd LSTM cell on lane-concatenated state [fwd | bwd]:
        # one (Bb,2H)@(2H,8H) MXU matmul, one 6H-wide sigmoid, two 2H-wide tanh,
        # one fused c/h update -- 2x lane density vs per-direction cells.
        pre = jnp.where(bwd_lanes, pre_b, pre_f)                         # (Bb, 8H)
        gates = pre + jnp.dot(hc, whh, preferred_element_type=jnp.float32)
        sig = jax.nn.sigmoid(gates[:, :6 * H])
        g = jnp.tanh(gates[:, 6 * H:])
        i = sig[:, :2 * H]
        f = sig[:, 2 * H:4 * H]
        o = sig[:, 4 * H:]
        c_new = f * cc + i * g
        h_new = o * jnp.tanh(c_new)
        m = (lower <= t) & (upper > t)                                   # validity (Bb, 2H)
        return jnp.where(m, h_new, hc), jnp.where(m, c_new, cc)

    hc = jnp.zeros((Bb, 2 * H), jnp.float32)   # [h_fwd | h_bwd]
    cc = jnp.zeros((Bb, 2 * H), jnp.float32)   # [c_fwd | c_bwd]

    if not scratch:
        # small T: fully unrolled; xproj row slices are static, sublane-aligned subviews.
        for t in range(T):
            tb = T - 1 - t
            hc, cc = step(t,
                          xproj[t * Bb:(t + 1) * Bb],
                          xproj[tb * Bb:(tb + 1) * Bb],
                          hc, cc)
    else:
        # large T: stash xproj in VMEM scratch, partially-unrolled fori_loop (LLO visibility
        # without the full-unroll instruction/live-range blowup).
        xproj_ref, = scratch
        xproj_ref[...] = xproj

        def body(t, carry):
            hc, cc = carry
            tb = T - 1 - t
            pf = xproj_ref[pl.ds(pl.multiple_of(t * Bb, Bb), Bb), :]
            pb = xproj_ref[pl.ds(pl.multiple_of(tb * Bb, Bb), Bb), :]
            return step(t, pf, pb, hc, cc)

        hc, cc = lax.fori_loop(0, T, body, (hc, cc), unroll=fori_unroll)

    # final hidden states: already lane-concatenated [fwd | bwd] == h_n.permute(1,0,2).view(B,2H)
    out_ref[...] = hc


# --------------------------------------------------------------------------- #
# Block-size heuristic (vreg + VMEM budget aware, megacore friendly)
# --------------------------------------------------------------------------- #
def _vmem_estimate(bb, T, E, H, x_bytes):
    x_blk = 2 * T * bb * E * x_bytes                 # double-buffered x block
    xproj = T * bb * 8 * H * 4                       # hoisted projection (value or scratch)
    weights = E * 8 * H * x_bytes + (2 * H + 1) * 8 * H * 4   # single-buffered constants
    state = 8 * bb * 2 * H * 4                       # carried h/c + gate temporaries
    return x_blk + xproj + weights + state + (1 << 20)


def _choose_batch_block(B, T, E, H, x_bytes):
    # carried h/c state (2 x (Bb, 2H) f32) kept under ~half the 256 KiB vreg file
    cap = max(8, min(128, (128 * 1024) // max(1, 16 * H)))
    cap = (cap // 8) * 8
    B8 = -(-B // 8) * 8
    bb = min(cap, B8)
    # keep the per-block working set under ~28 MiB (v7x: 64 MiB physical VMEM)
    while bb > 8 and _vmem_estimate(bb, T, E, H, x_bytes) > 28 * (1 << 20):
        bb -= 8
    # v7x megacore: prefer >= 2 grid steps on the "parallel" batch axis when batch allows
    if B8 // bb < 2 and B8 >= 16:
        bb = max(8, ((B8 // 2) // 8) * 8)
    return bb


# --------------------------------------------------------------------------- #
# Wrapper
# --------------------------------------------------------------------------- #
def sentence_model_forward(question_embeds, reverse_question_indexs, question_lengths,
                           kparams, *, batch_block=None, unroll_threshold=32, fori_unroll=8):
    """question_embeds: (T, B, E) f32, time-major; lengths sorted descending
    (pack_padded_sequence default). Returns (B, 2H) f32 in original question order."""
    T, B, E = question_embeds.shape
    H = kparams["whh_bd"].shape[0] // 2
    in_dtype = kparams["wih_cat"].dtype
    x_bytes = jnp.dtype(in_dtype).itemsize

    if batch_block is None:
        bb = _choose_batch_block(B, T, E, H, x_bytes)
    else:
        bb = max(8, (-(-batch_block // 8)) * 8)
    est = _vmem_estimate(bb, T, E, H, x_bytes)
    vmem_limit = int(min(max(int(1.5 * est), 32 << 20), 48 << 20))

    # pad batch to a multiple of the chosen block; padded rows get length 0 -> never updated.
    B_pad = -(-B // bb) * bb
    pad = B_pad - B
    x = question_embeds.astype(in_dtype)
    lens = question_lengths.astype(jnp.int32)
    if pad:
        x = jnp.pad(x, ((0, 0), (0, pad), (0, 0)))
        lens = jnp.pad(lens, (0, pad))
    lens2d = lens[:, None]                                   # (B_pad, 1) int32

    unrolled = T <= unroll_threshold
    scratch_shapes = [] if unrolled else [pltpu.VMEM((T * bb, 8 * H), jnp.float32)]

    kernel = functools.partial(bilstm_kernel, seq_len=T, hidden=H, fori_unroll=fori_unroll)

    def weight_spec(shape):
        # grid-invariant block: single-buffer it instead of the default double buffer.
        return pl.BlockSpec(shape, lambda b: (0, 0), pipeline_mode=pl.Buffered(1))

    h_cat = pl.pallas_call(
        kernel,
        out_shape=jax.ShapeDtypeStruct((B_pad, 2 * H), jnp.float32),
        grid=(B_pad // bb,),
        in_specs=[
            pl.BlockSpec((T, bb, E), lambda b: (0, b, 0)),   # x (time-major)
            pl.BlockSpec((bb, 1), lambda b: (b, 0)),         # per-row valid lengths
            weight_spec((E, 8 * H)),                         # W_ih, interleaved gate cols
            weight_spec((2 * H, 8 * H)),                     # block-sparse W_hh (both dirs)
            weight_spec((1, 8 * H)),                         # fused b_ih + b_hh
        ],
        out_specs=pl.BlockSpec((bb, 2 * H), lambda b: (b, 0)),
        scratch_shapes=scratch_shapes,
        compiler_params=pltpu.CompilerParams(
            dimension_semantics=("parallel",),
            vmem_limit_bytes=vmem_limit),
    )(x, lens2d, kparams["wih_cat"], kparams["whh_bd"], kparams["b_cat"])

    # glue: drop batch padding, un-sort back to original question order
    return h_cat[:B][reverse_question_indexs]


# --------------------------------------------------------------------------- #
# Parameters (PyTorch nn.LSTM layout) + one-time re-layout for the kernel
# --------------------------------------------------------------------------- #
def init_params(key, embed_dim, hidden_dim):
    """PyTorch nn.LSTM(bidirectional=True) layout: W_ih (4H,E), W_hh (4H,H),
    b_ih/b_hh (4H,), gate row order [i, f, g, o]; one set per direction."""
    bound = 1.0 / math.sqrt(hidden_dim)
    ks = jax.random.split(key, 8)
    u = lambda kk, shape: jax.random.uniform(kk, shape, jnp.float32, -bound, bound)
    return dict(
        w_ih_f=u(ks[0], (4 * hidden_dim, embed_dim)),
        w_hh_f=u(ks[1], (4 * hidden_dim, hidden_dim)),
        b_ih_f=u(ks[2], (4 * hidden_dim,)),
        b_hh_f=u(ks[3], (4 * hidden_dim,)),
        w_ih_b=u(ks[4], (4 * hidden_dim, embed_dim)),
        w_hh_b=u(ks[5], (4 * hidden_dim, hidden_dim)),
        b_ih_b=u(ks[6], (4 * hidden_dim,)),
        b_hh_b=u(ks[7], (4 * hidden_dim,)),
    )


def _gate_rows(w, H):
    """Split PyTorch row order [i, f, g, o] into named (H, ...) blocks."""
    return dict(i=w[0:H], f=w[H:2 * H], g=w[2 * H:3 * H], o=w[3 * H:4 * H])


def prepare_kernel_params(p, input_dtype=jnp.bfloat16):
    """One-time (free) weight re-layout:
       * combined gate-column order [i_f,i_b,f_f,f_b,o_f,o_b,g_f,g_b] (sigmoid block first,
         tanh block last; per-gate fwd/bwd adjacent so the fused cell slices contiguously),
       * W_ih of both directions concatenated (E, 8H) and cast to `input_dtype` (bf16 default),
       * block-sparse W_hh (2H, 8H): rows 0:H act on h_fwd, rows H:2H on h_bwd,
       * b_ih + b_hh folded into one (1, 8H) f32 bias.
       NOTE: lane alignment of the per-step gate slices is best when H is a multiple of 64."""
    H = p["w_hh_f"].shape[1]
    gf, gb = _gate_rows(p["w_ih_f"], H), _gate_rows(p["w_ih_b"], H)
    hf, hb = _gate_rows(p["w_hh_f"], H), _gate_rows(p["w_hh_b"], H)
    bf = _gate_rows((p["b_ih_f"] + p["b_hh_f"])[:, None], H)
    bb = _gate_rows((p["b_ih_b"] + p["b_hh_b"])[:, None], H)

    order = ("i", "f", "o", "g")
    z = jnp.zeros((H, H), jnp.float32)

    wih_cols, b_cols, whh_cols = [], [], []
    for g in order:
        wih_cols += [gf[g].T, gb[g].T]                                     # (E, H) each
        b_cols += [bf[g].T, bb[g].T]                                       # (1, H) each
        whh_cols += [jnp.concatenate([hf[g].T, z], axis=0),                # fwd column block
                     jnp.concatenate([z, hb[g].T], axis=0)]                # bwd column block

    return dict(
        wih_cat=jnp.concatenate(wih_cols, axis=1).astype(input_dtype),     # (E, 8H)
        whh_bd=jnp.concatenate(whh_cols, axis=1),                          # (2H, 8H) f32
        b_cat=jnp.concatenate(b_cols, axis=1),                             # (1, 8H) f32
    )


# --------------------------------------------------------------------------- #
# Pure-JAX reference (PyTorch math, gate order [i, f, g, o])
# --------------------------------------------------------------------------- #
def _reference_forward(question_embeds, reverse_question_indexs, question_lengths, p):
    T, B, E = question_embeds.shape
    H = p["w_hh_f"].shape[1]
    lens = question_lengths.astype(jnp.int32)

    def run(xs, ts, w_ih, w_hh, b_ih, b_hh):
        def step(carry, inp):
            h, c = carry
            x_t, t = inp
            gates = x_t @ w_ih.T + h @ w_hh.T + b_ih + b_hh
            i = jax.nn.sigmoid(gates[:, 0 * H:1 * H])
            f = jax.nn.sigmoid(gates[:, 1 * H:2 * H])
            g = jnp.tanh(gates[:, 2 * H:3 * H])
            o = jax.nn.sigmoid(gates[:, 3 * H:4 * H])
            c_new = f * c + i * g
            h_new = o * jnp.tanh(c_new)
            m = (t < lens)[:, None]
            return (jnp.where(m, h_new, h), jnp.where(m, c_new, c)), None

        init = (jnp.zeros((B, H), jnp.float32), jnp.zeros((B, H), jnp.float32))
        (h, _), _ = lax.scan(step, init, (xs, ts))
        return h

    ts = jnp.arange(T)
    h_f = run(question_embeds, ts,
              p["w_ih_f"], p["w_hh_f"], p["b_ih_f"], p["b_hh_f"])
    h_b = run(question_embeds[::-1], ts[::-1],
              p["w_ih_b"], p["w_hh_b"], p["b_ih_b"], p["b_hh_b"])
    return jnp.concatenate([h_f, h_b], axis=-1)[reverse_question_indexs]


if __name__ == "__main__":
    key = jax.random.PRNGKey(0)
    k_x, k_p, k_x2, k_l2 = jax.random.split(key, 4)

    # ---- test 1: small seq (fully-unrolled path), f32 (tight tol) and bf16 projection ----
    T, B, E, H = 8, 4, 32, 32   # seq=8, batch=4, n_embeds=32, n_hiddens=32
    question_embeds = jax.random.normal(k_x, (T, B, E), jnp.float32)
    question_lengths = jnp.array([8, 7, 5, 3], jnp.int32)       # sorted desc (packed default)
    reverse_question_indexs = jnp.array([2, 0, 3, 1], jnp.int32)

    params = init_params(k_p, E, H)
    ref = _reference_forward(question_embeds, reverse_question_indexs,
                             question_lengths, params)

    out32 = sentence_model_forward(
        question_embeds, reverse_question_indexs, question_lengths,
        prepare_kernel_params(params, input_dtype=jnp.float32))
    out32 = jax.block_until_ready(out32)
    assert out32.shape == (B, 2 * H)
    assert jnp.allclose(out32, ref, atol=1e-4, rtol=1e-4), "f32 mismatch vs reference"

    out16 = sentence_model_forward(
        question_embeds, reverse_question_indexs, question_lengths,
        prepare_kernel_params(params, input_dtype=jnp.bfloat16))
    out16 = jax.block_until_ready(out16)
    assert jnp.allclose(out16, ref, atol=5e-2, rtol=5e-2), "bf16 mismatch vs reference"

    # ---- test 2: longer seq (VMEM-scratch + fori_loop path), batch > block, grid >= 2 ----
    T2, B2 = 48, 12
    x2 = jax.random.normal(k_x2, (T2, B2, E), jnp.float32)
    lens2 = jnp.sort(jax.random.randint(k_l2, (B2,), 1, T2 + 1))[::-1].astype(jnp.int32)
    rev2 = jax.random.permutation(jax.random.PRNGKey(7), B2).astype(jnp.int32)
    params2 = init_params(jax.random.PRNGKey(3), E, H)
    ref2 = _reference_forward(x2, rev2, lens2, params2)

    out2 = sentence_model_forward(
        x2, rev2, lens2, prepare_kernel_params(params2, input_dtype=jnp.float32))
    out2 = jax.block_until_ready(out2)
    assert out2.shape == (B2, 2 * H)
    assert jnp.allclose(out2, ref2, atol=1e-4, rtol=1e-4), "long-seq mismatch vs reference"

    print("KERNEL_OK")
</pallas_src>

<mosaic_0001>
module attributes {stable_mosaic.version = 11 : i64} {
  func.func @bilstm_kernel(%arg0: i32, %arg1: memref<8x8x32xf32, #tpu.memory_space<vmem>>, %arg2: memref<8x1xi32, #tpu.memory_space<vmem>>, %arg3: memref<32x256xf32, #tpu.memory_space<vmem>>, %arg4: memref<64x256xf32, #tpu.memory_space<vmem>>, %arg5: memref<1x256xf32, #tpu.memory_space<vmem>>, %arg6: memref<8x64xf32, #tpu.memory_space<vmem>>) attributes {dimension_semantics = [#tpu.dimension_semantics<parallel>], iteration_bounds = array<i64: 1>, scalar_prefetch = 0 : i64, scratch_operands = 0 : i64, tpu.core_type = #tpu.core_type<tc>, window_params = [{transform_indices = @transform_0, window_bounds = array<i64: 8, 8, 32>}, {transform_indices = @transform_1, window_bounds = array<i64: 8, 1>}, {pipeline_mode = #tpu.pipeline_mode<synchronous>, transform_indices = @transform_2, window_bounds = array<i64: 32, 256>}, {pipeline_mode = #tpu.pipeline_mode<synchronous>, transform_indices = @transform_3, window_bounds = array<i64: 64, 256>}, {pipeline_mode = #tpu.pipeline_mode<synchronous>, transform_indices = @transform_4, window_bounds = array<i64: 1, 256>}, {transform_indices = @transform_5, window_bounds = array<i64: 8, 64>}]} {
    %c0 = arith.constant 0 : index
    %c0_0 = arith.constant 0 : index
    %c0_1 = arith.constant 0 : index
    %0 = vector.load %arg1[%c0, %c0_0, %c0_1] : memref<8x8x32xf32, #tpu.memory_space<vmem>>, vector<8x8x32xf32>
    %1 = vector.shape_cast %0 : vector<8x8x32xf32> to vector<64x32xf32>
    %c0_2 = arith.constant 0 : index
    %c0_3 = arith.constant 0 : index
    %2 = vector.load %arg3[%c0_2, %c0_3] : memref<32x256xf32, #tpu.memory_space<vmem>>, vector<32x256xf32>
    %cst = arith.constant dense<0.000000e+00> : vector<64x256xf32>
    %3 = tpu.matmul %1, %2, %cst {dimension_numbers = #tpu.dot_dimension_numbers<[1], [0], [0], [1], [0, 0, 1, 1], [], []>} : vector<64x32xf32>, vector<32x256xf32>, vector<64x256xf32> -> vector<64x256xf32>
    %c0_4 = arith.constant 0 : index
    %c0_5 = arith.constant 0 : index
    %4 = vector.load %arg5[%c0_4, %c0_5] : memref<1x256xf32, #tpu.memory_space<vmem>>, vector<1x256xf32>
    %5 = vector.broadcast %4 : vector<1x256xf32> to vector<64x256xf32>
    %6 = arith.addf %3, %5 : vector<64x256xf32>
    %c0_6 = arith.constant 0 : index
    %c0_7 = arith.constant 0 : index
    %7 = vector.load %arg2[%c0_6, %c0_7] : memref<8x1xi32, #tpu.memory_space<vmem>>, vector<8x1xi32>
    %8 = tpu.iota {dimensions = array<i32: 1>} : vector<1x256xi32>
    %c32_i32 = arith.constant 32 : i32
    %9 = vector.broadcast %c32_i32 : i32 to vector<1x256xi32>
    %10 = arith.cmpi sge, %8, %9 : vector<1x256xi32>
    %c64_i32 = arith.constant 64 : i32
    %11 = vector.broadcast %c64_i32 : i32 to vector<1x256xi32>
    %12 = arith.cmpi slt, %8, %11 : vector<1x256xi32>
    %13 = arith.andi %10, %12 : vector<1x256xi1>
    %c96_i32 = arith.constant 96 : i32
    %14 = vector.broadcast %c96_i32 : i32 to vector<1x256xi32>
    %15 = arith.cmpi sge, %8, %14 : vector<1x256xi32>
    %c128_i32 = arith.constant 128 : i32
    %16 = vector.broadcast %c128_i32 : i32 to vector<1x256xi32>
    %17 = arith.cmpi slt, %8, %16 : vector<1x256xi32>
    %18 = arith.andi %15, %17 : vector<1x256xi1>
    %19 = arith.ori %13, %18 : vector<1x256xi1>
    %c160_i32 = arith.constant 160 : i32
    %20 = vector.broadcast %c160_i32 : i32 to vector<1x256xi32>
    %21 = arith.cmpi sge, %8, %20 : vector<1x256xi32>
    %c192_i32 = arith.constant 192 : i32
    %22 = vector.broadcast %c192_i32 : i32 to vector<1x256xi32>
    %23 = arith.cmpi slt, %8, %22 : vector<1x256xi32>
    %24 = arith.andi %21, %23 : vector<1x256xi1>
    %25 = arith.ori %19, %24 : vector<1x256xi1>
    %c224_i32 = arith.constant 224 : i32
    %26 = vector.broadcast %c224_i32 : i32 to vector<1x256xi32>
    %27 = arith.cmpi sge, %8, %26 : vector<1x256xi32>
    %28 = arith.ori %25, %27 : vector<1x256xi1>
    %29 = tpu.iota {dimensions = array<i32: 1>} : vector<1x64xi32>
    %c32_i32_8 = arith.constant 32 : i32
    %30 = vector.broadcast %c32_i32_8 : i32 to vector<1x64xi32>
    %31 = arith.cmpi sge, %29, %30 : vector<1x64xi32>
    %c8_i32 = arith.constant 8 : i32
    %32 = vector.broadcast %c8_i32 : i32 to vector<8x1xi32>
    %33 = arith.subi %32, %7 : vector<8x1xi32>
    %c0_i32 = arith.constant 0 : i32
    %34 = vector.shape_cast %31 : vector<1x64xi1> to vector<1x64xi1>
    %35 = vector.broadcast %34 : vector<1x64xi1> to vector<8x64xi1>
    %36 = vector.shape_cast %33 : vector<8x1xi32> to vector<8x1xi32>
    %37 = vector.broadcast %36 : vector<8x1xi32> to vector<8x64xi32>
    %38 = vector.broadcast %c0_i32 : i32 to vector<8x64xi32>
    %39 = arith.select %35, %37, %38 : vector<8x64xi1>, vector<8x64xi32>
    %c8_i32_9 = arith.constant 8 : i32
    %40 = vector.shape_cast %31 : vector<1x64xi1> to vector<1x64xi1>
    %41 = vector.broadcast %40 : vector<1x64xi1> to vector<8x64xi1>
    %42 = vector.broadcast %c8_i32_9 : i32 to vector<8x64xi32>
    %43 = vector.shape_cast %7 : vector<8x1xi32> to vector<8x1xi32>
    %44 = vector.broadcast %43 : vector<8x1xi32> to vector<8x64xi32>
    %45 = arith.select %41, %42, %44 : vector<8x64xi1>, vector<8x64xi32>
    %c0_10 = arith.constant 0 : index
    %c0_11 = arith.constant 0 : index
    %46 = vector.load %arg4[%c0_10, %c0_11] : memref<64x256xf32, #tpu.memory_space<vmem>>, vector<64x256xf32>
    %cst_12 = arith.constant 0.000000e+00 : f32
    %47 = vector.broadcast %cst_12 : f32 to vector<8x64xf32>
    %cst_13 = arith.constant 0.000000e+00 : f32
    %48 = vector.broadcast %cst_13 : f32 to vector<8x64xf32>
    %49 = vector.extract_strided_slice %6 {offsets = [0, 0], sizes = [8, 256], strides = [1, 1]} : vector<64x256xf32> to vector<8x256xf32>
    %50 = vector.extract_strided_slice %6 {offsets = [56, 0], sizes = [8, 256], strides = [1, 1]} : vector<64x256xf32> to vector<8x256xf32>
    %51 = vector.shape_cast %28 : vector<1x256xi1> to vector<1x256xi1>
    %52 = vector.broadcast %51 : vector<1x256xi1> to vector<8x256xi1>
    %53 = arith.select %52, %50, %49 : vector<8x256xi1>, vector<8x256xf32>
    %cst_14 = arith.constant dense<0.000000e+00> : vector<8x256xf32>
    %54 = tpu.matmul %47, %46, %cst_14 {dimension_numbers = #tpu.dot_dimension_numbers<[1], [0], [0], [1], [0, 0, 1, 1], [], []>} : vector<8x64xf32>, vector<64x256xf32>, vector<8x256xf32> -> vector<8x256xf32>
    %55 = arith.addf %53, %54 : vector<8x256xf32>
    %56 = vector.extract_strided_slice %55 {offsets = [0, 0], sizes = [8, 192], strides = [1, 1]} : vector<8x256xf32> to vector<8x192xf32>
    %57 = arith.negf %56 : vector<8x192xf32>
    %58 = math.exp %57 : vector<8x192xf32>
    %cst_15 = arith.constant 1.000000e+00 : f32
    %59 = vector.broadcast %cst_15 : f32 to vector<8x192xf32>
    %60 = arith.addf %59, %58 : vector<8x192xf32>
    %61 = arith.divf %59, %60 : vector<8x192xf32>
    %62 = vector.extract_strided_slice %55 {offsets = [0, 192], sizes = [8, 64], strides = [1, 1]} : vector<8x256xf32> to vector<8x64xf32>
    %63 = math.tanh %62 : vector<8x64xf32>
    %64 = vector.extract_strided_slice %61 {offsets = [0, 0], sizes = [8, 64], strides = [1, 1]} : vector<8x192xf32> to vector<8x64xf32>
    %65 = vector.extract_strided_slice %61 {offsets = [0, 64], sizes = [8, 64], strides = [1, 1]} : vector<8x192xf32> to vector<8x64xf32>
    %66 = vector.extract_strided_slice %61 {offsets = [0, 128], sizes = [8, 64], strides = [1, 1]} : vector<8x192xf32> to vector<8x64xf32>
    %67 = arith.mulf %65, %48 : vector<8x64xf32>
    %68 = arith.mulf %64, %63 : vector<8x64xf32>
    %69 = arith.addf %67, %68 : vector<8x64xf32>
    %70 = math.tanh %69 : vector<8x64xf32>
    %71 = arith.mulf %66, %70 : vector<8x64xf32>
    %c0_i32_16 = arith.constant 0 : i32
    %72 = vector.broadcast %c0_i32_16 : i32 to vector<8x64xi32>
    %73 = arith.cmpi sle, %39, %72 : vector<8x64xi32>
    %c0_i32_17 = arith.constant 0 : i32
    %74 = vector.broadcast %c0_i32_17 : i32 to vector<8x64xi32>
    %75 = arith.cmpi sgt, %45, %74 : vector<8x64xi32>
    %76 = arith.andi %73, %75 : vector<8x64xi1>
    %77 = arith.select %76, %71, %47 : vector<8x64xi1>, vector<8x64xf32>
    %78 = arith.select %76, %69, %48 : vector<8x64xi1>, vector<8x64xf32>
    %79 = vector.extract_strided_slice %6 {offsets = [8, 0], sizes = [8, 256], strides = [1, 1]} : vector<64x256xf32> to vector<8x256xf32>
    %80 = vector.extract_strided_slice %6 {offsets = [48, 0], sizes = [8, 256], strides = [1, 1]} : vector<64x256xf32> to vector<8x256xf32>
    %81 = vector.shape_cast %28 : vector<1x256xi1> to vector<1x256xi1>
    %82 = vector.broadcast %81 : vector<1x256xi1> to vector<8x256xi1>
    %83 = arith.select %82, %80, %79 : vector<8x256xi1>, vector<8x256xf32>
    %cst_18 = arith.constant dense<0.000000e+00> : vector<8x256xf32>
    %84 = tpu.matmul %77, %46, %cst_18 {dimension_numbers = #tpu.dot_dimension_numbers<[1], [0], [0], [1], [0, 0, 1, 1], [], []>} : vector<8x64xf32>, vector<64x256xf32>, vector<8x256xf32> -> vector<8x256xf32>
    %85 = arith.addf %83, %84 : vector<8x256xf32>
    %86 = vector.extract_strided_slice %85 {offsets = [0, 0], sizes = [8, 192], strides = [1, 1]} : vector<8x256xf32> to vector<8x192xf32>
    %87 = arith.negf %86 : vector<8x192xf32>
    %88 = math.exp %87 : vector<8x192xf32>
    %cst_19 = arith.constant 1.000000e+00 : f32
    %89 = vector.broadcast %cst_19 : f32 to vector<8x192xf32>
    %90 = arith.addf %89, %88 : vector<8x192xf32>
    %91 = arith.divf %89, %90 : vector<8x192xf32>
    %92 = vector.extract_strided_slice %85 {offsets = [0, 192], sizes = [8, 64], strides = [1, 1]} : vector<8x256xf32> to vector<8x64xf32>
    %93 = math.tanh %92 : vector<8x64xf32>
    %94 = vector.extract_strided_slice %91 {offsets = [0, 0], sizes = [8, 64], strides = [1, 1]} : vector<8x192xf32> to vector<8x64xf32>
    %95 = vector.extract_strided_slice %91 {offsets = [0, 64], sizes = [8, 64], strides = [1, 1]} : vector<8x192xf32> to vector<8x64xf32>
    %96 = vector.extract_strided_slice %91 {offsets = [0, 128], sizes = [8, 64], strides = [1, 1]} : vector<8x192xf32> to vector<8x64xf32>
    %97 = arith.mulf %95, %78 : vector<8x64xf32>
    %98 = arith.mulf %94, %93 : vector<8x64xf32>
    %99 = arith.addf %97, %98 : vector<8x64xf32>
    %100 = math.tanh %99 : vector<8x64xf32>
    %101 = arith.mulf %96, %100 : vector<8x64xf32>
    %c1_i32 = arith.constant 1 : i32
    %102 = vector.broadcast %c1_i32 : i32 to vector<8x64xi32>
    %103 = arith.cmpi sle, %39, %102 : vector<8x64xi32>
    %c1_i32_20 = arith.constant 1 : i32
    %104 = vector.broadcast %c1_i32_20 : i32 to vector<8x64xi32>
    %105 = arith.cmpi sgt, %45, %104 : vector<8x64xi32>
    %106 = arith.andi %103, %105 : vector<8x64xi1>
    %107 = arith.select %106, %101, %77 : vector<8x64xi1>, vector<8x64xf32>
    %108 = arith.select %106, %99, %78 : vector<8x64xi1>, vector<8x64xf32>
    %109 = vector.extract_strided_slice %6 {offsets = [16, 0], sizes = [8, 256], strides = [1, 1]} : vector<64x256xf32> to vector<8x256xf32>
    %110 = vector.extract_strided_slice %6 {offsets = [40, 0], sizes = [8, 256], strides = [1, 1]} : vector<64x256xf32> to vector<8x256xf32>
    %111 = vector.shape_cast %28 : vector<1x256xi1> to vector<1x256xi1>
    %112 = vector.broadcast %111 : vector<1x256xi1> to vector<8x256xi1>
    %113 = arith.select %112, %110, %109 : vector<8x256xi1>, vector<8x256xf32>
    %cst_21 = arith.constant dense<0.000000e+00> : vector<8x256xf32>
    %114 = tpu.matmul %107, %46, %cst_21 {dimension_numbers = #tpu.dot_dimension_numbers<[1], [0], [0], [1], [0, 0, 1, 1], [], []>} : vector<8x64xf32>, vector<64x256xf32>, vector<8x256xf32> -> vector<8x256xf32>
    %115 = arith.addf %113, %114 : vector<8x256xf32>
    %116 = vector.extract_strided_slice %115 {offsets = [0, 0], sizes = [8, 192], strides = [1, 1]} : vector<8x256xf32> to vector<8x192xf32>
    %117 = arith.negf %116 : vector<8x192xf32>
    %118 = math.exp %117 : vector<8x192xf32>
    %cst_22 = arith.constant 1.000000e+00 : f32
    %119 = vector.broadcast %cst_22 : f32 to vector<8x192xf32>
    %120 = arith.addf %119, %118 : vector<8x192xf32>
    %121 = arith.divf %119, %120 : vector<8x192xf32>
    %122 = vector.extract_strided_slice %115 {offsets = [0, 192], sizes = [8, 64], strides = [1, 1]} : vector<8x256xf32> to vector<8x64xf32>
    %123 = math.tanh %122 : vector<8x64xf32>
    %124 = vector.extract_strided_slice %121 {offsets = [0, 0], sizes = [8, 64], strides = [1, 1]} : vector<8x192xf32> to vector<8x64xf32>
    %125 = vector.extract_strided_slice %121 {offsets = [0, 64], sizes = [8, 64], strides = [1, 1]} : vector<8x192xf32> to vector<8x64xf32>
    %126 = vector.extract_strided_slice %121 {offsets = [0, 128], sizes = [8, 64], strides = [1, 1]} : vector<8x192xf32> to vector<8x64xf32>
    %127 = arith.mulf %125, %108 : vector<8x64xf32>
    %128 = arith.mulf %124, %123 : vector<8x64xf32>
    %129 = arith.addf %127, %128 : vector<8x64xf32>
    %130 = math.tanh %129 : vector<8x64xf32>
    %131 = arith.mulf %126, %130 : vector<8x64xf32>
    %c2_i32 = arith.constant 2 : i32
    %132 = vector.broadcast %c2_i32 : i32 to vector<8x64xi32>
    %133 = arith.cmpi sle, %39, %132 : vector<8x64xi32>
    %c2_i32_23 = arith.constant 2 : i32
    %134 = vector.broadcast %c2_i32_23 : i32 to vector<8x64xi32>
    %135 = arith.cmpi sgt, %45, %134 : vector<8x64xi32>
    %136 = arith.andi %133, %135 : vector<8x64xi1>
    %137 = arith.select %136, %131, %107 : vector<8x64xi1>, vector<8x64xf32>
    %138 = arith.select %136, %129, %108 : vector<8x64xi1>, vector<8x64xf32>
    %139 = vector.extract_strided_slice %6 {offsets = [24, 0], sizes = [8, 256], strides = [1, 1]} : vector<64x256xf32> to vector<8x256xf32>
    %140 = vector.extract_strided_slice %6 {offsets = [32, 0], sizes = [8, 256], strides = [1, 1]} : vector<64x256xf32> to vector<8x256xf32>
    %141 = vector.shape_cast %28 : vector<1x256xi1> to vector<1x256xi1>
    %142 = vector.broadcast %141 : vector<1x256xi1> to vector<8x256xi1>
    %143 = arith.select %142, %140, %139 : vector<8x256xi1>, vector<8x256xf32>
    %cst_24 = arith.constant dense<0.000000e+00> : vector<8x256xf32>
    %144 = tpu.matmul %137, %46, %cst_24 {dimension_numbers = #tpu.dot_dimension_numbers<[1], [0], [0], [1], [0, 0, 1, 1], [], []>} : vector<8x64xf32>, vector<64x256xf32>, vector<8x256xf32> -> vector<8x256xf32>
    %145 = arith.addf %143, %144 : vector<8x256xf32>
    %146 = vector.extract_strided_slice %145 {offsets = [0, 0], sizes = [8, 192], strides = [1, 1]} : vector<8x256xf32> to vector<8x192xf32>
    %147 = arith.negf %146 : vector<8x192xf32>
    %148 = math.exp %147 : vector<8x192xf32>
    %cst_25 = arith.constant 1.000000e+00 : f32
    %149 = vector.broadcast %cst_25 : f32 to vector<8x192xf32>
    %150 = arith.addf %149, %148 : vector<8x192xf32>
    %151 = arith.divf %149, %150 : vector<8x192xf32>
    %152 = vector.extract_strided_slice %145 {offsets = [0, 192], sizes = [8, 64], strides = [1, 1]} : vector<8x256xf32> to vector<8x64xf32>
    %153 = math.tanh %152 : vector<8x64xf32>
    %154 = vector.extract_strided_slice %151 {offsets = [0, 0], sizes = [8, 64], strides = [1, 1]} : vector<8x192xf32> to vector<8x64xf32>
    %155 = vector.extract_strided_slice %151 {offsets = [0, 64], sizes = [8, 64], strides = [1, 1]} : vector<8x192xf32> to vector<8x64xf32>
    %156 = vector.extract_strided_slice %151 {offsets = [0, 128], sizes = [8, 64], strides = [1, 1]} : vector<8x192xf32> to vector<8x64xf32>
    %157 = arith.mulf %155, %138 : vector<8x64xf32>
    %158 = arith.mulf %154, %153 : vector<8x64xf32>
    %159 = arith.addf %157, %158 : vector<8x64xf32>
    %160 = math.tanh %159 : vector<8x64xf32>
    %161 = arith.mulf %156, %160 : vector<8x64xf32>
    %c3_i32 = arith.constant 3 : i32
    %162 = vector.broadcast %c3_i32 : i32 to vector<8x64xi32>
    %163 = arith.cmpi sle, %39, %162 : vector<8x64xi32>
    %c3_i32_26 = arith.constant 3 : i32
    %164 = vector.broadcast %c3_i32_26 : i32 to vector<8x64xi32>
    %165 = arith.cmpi sgt, %45, %164 : vector<8x64xi32>
    %166 = arith.andi %163, %165 : vector<8x64xi1>
    %167 = arith.select %166, %161, %137 : vector<8x64xi1>, vector<8x64xf32>
    %168 = arith.select %166, %159, %138 : vector<8x64xi1>, vector<8x64xf32>
    %169 = vector.extract_strided_slice %6 {offsets = [32, 0], sizes = [8, 256], strides = [1, 1]} : vector<64x256xf32> to vector<8x256xf32>
    %170 = vector.extract_strided_slice %6 {offsets = [24, 0], sizes = [8, 256], strides = [1, 1]} : vector<64x256xf32> to vector<8x256xf32>
    %171 = vector.shape_cast %28 : vector<1x256xi1> to vector<1x256xi1>
    %172 = vector.broadcast %171 : vector<1x256xi1> to vector<8x256xi1>
    %173 = arith.select %172, %170, %169 : vector<8x256xi1>, vector<8x256xf32>
    %cst_27 = arith.constant dense<0.000000e+00> : vector<8x256xf32>
    %174 = tpu.matmul %167, %46, %cst_27 {dimension_numbers = #tpu.dot_dimension_numbers<[1], [0], [0], [1], [0, 0, 1, 1], [], []>} : vector<8x64xf32>, vector<64x256xf32>, vector<8x256xf32> -> vector<8x256xf32>
    %175 = arith.addf %173, %174 : vector<8x256xf32>
    %176 = vector.extract_strided_slice %175 {offsets = [0, 0], sizes = [8, 192], strides = [1, 1]} : vector<8x256xf32> to vector<8x192xf32>
    %177 = arith.negf %176 : vector<8x192xf32>
    %178 = math.exp %177 : vector<8x192xf32>
    %cst_28 = arith.constant 1.000000e+00 : f32
    %179 = vector.broadcast %cst_28 : f32 to vector<8x192xf32>
    %180 = arith.addf %179, %178 : vector<8x192xf32>
    %181 = arith.divf %179, %180 : vector<8x192xf32>
    %182 = vector.extract_strided_slice %175 {offsets = [0, 192], sizes = [8, 64], strides = [1, 1]} : vector<8x256xf32> to vector<8x64xf32>
    %183 = math.tanh %182 : vector<8x64xf32>
    %184 = vector.extract_strided_slice %181 {offsets = [0, 0], sizes = [8, 64], strides = [1, 1]} : vector<8x192xf32> to vector<8x64xf32>
    %185 = vector.extract_strided_slice %181 {offsets = [0, 64], sizes = [8, 64], strides = [1, 1]} : vector<8x192xf32> to vector<8x64xf32>
    %186 = vector.extract_strided_slice %181 {offsets = [0, 128], sizes = [8, 64], strides = [1, 1]} : vector<8x192xf32> to vector<8x64xf32>
    %187 = arith.mulf %185, %168 : vector<8x64xf32>
    %188 = arith.mulf %184, %183 : vector<8x64xf32>
    %189 = arith.addf %187, %188 : vector<8x64xf32>
    %190 = math.tanh %189 : vector<8x64xf32>
    %191 = arith.mulf %186, %190 : vector<8x64xf32>
    %c4_i32 = arith.constant 4 : i32
    %192 = vector.broadcast %c4_i32 : i32 to vector<8x64xi32>
    %193 = arith.cmpi sle, %39, %192 : vector<8x64xi32>
    %c4_i32_29 = arith.constant 4 : i32
    %194 = vector.broadcast %c4_i32_29 : i32 to vector<8x64xi32>
    %195 = arith.cmpi sgt, %45, %194 : vector<8x64xi32>
    %196 = arith.andi %193, %195 : vector<8x64xi1>
    %197 = arith.select %196, %191, %167 : vector<8x64xi1>, vector<8x64xf32>
    %198 = arith.select %196, %189, %168 : vector<8x64xi1>, vector<8x64xf32>
    %199 = vector.extract_strided_slice %6 {offsets = [40, 0], sizes = [8, 256], strides = [1, 1]} : vector<64x256xf32> to vector<8x256xf32>
    %200 = vector.extract_strided_slice %6 {offsets = [16, 0], sizes = [8, 256], strides = [1, 1]} : vector<64x256xf32> to vector<8x256xf32>
    %201 = vector.shape_cast %28 : vector<1x256xi1> to vector<1x256xi1>
    %202 = vector.broadcast %201 : vector<1x256xi1> to vector<8x256xi1>
    %203 = arith.select %202, %200, %199 : vector<8x256xi1>, vector<8x256xf32>
    %cst_30 = arith.constant dense<0.000000e+00> : vector<8x256xf32>
    %204 = tpu.matmul %197, %46, %cst_30 {dimension_numbers = #tpu.dot_dimension_numbers<[1], [0], [0], [1], [0, 0, 1, 1], [], []>} : vector<8x64xf32>, vector<64x256xf32>, vector<8x256xf32> -> vector<8x256xf32>
    %205 = arith.addf %203, %204 : vector<8x256xf32>
    %206 = vector.extract_strided_slice %205 {offsets = [0, 0], sizes = [8, 192], strides = [1, 1]} : vector<8x256xf32> to vector<8x192xf32>
    %207 = arith.negf %206 : vector<8x192xf32>
    %208 = math.exp %207 : vector<8x192xf32>
    %cst_31 = arith.constant 1.000000e+00 : f32
    %209 = vector.broadcast %cst_31 : f32 to vector<8x192xf32>
    %210 = arith.addf %209, %208 : vector<8x192xf32>
    %211 = arith.divf %209, %210 : vector<8x192xf32>
    %212 = vector.extract_strided_slice %205 {offsets = [0, 192], sizes = [8, 64], strides = [1, 1]} : vector<8x256xf32> to vector<8x64xf32>
    %213 = math.tanh %212 : vector<8x64xf32>
    %214 = vector.extract_strided_slice %211 {offsets = [0, 0], sizes = [8, 64], strides = [1, 1]} : vector<8x192xf32> to vector<8x64xf32>
    %215 = vector.extract_strided_slice %211 {offsets = [0, 64], sizes = [8, 64], strides = [1, 1]} : vector<8x192xf32> to vector<8x64xf32>
    %216 = vector.extract_strided_slice %211 {offsets = [0, 128], sizes = [8, 64], strides = [1, 1]} : vector<8x192xf32> to vector<8x64xf32>
    %217 = arith.mulf %215, %198 : vector<8x64xf32>
    %218 = arith.mulf %214, %213 : vector<8x64xf32>
    %219 = arith.addf %217, %218 : vector<8x64xf32>
    %220 = math.tanh %219 : vector<8x64xf32>
    %221 = arith.mulf %216, %220 : vector<8x64xf32>
    %c5_i32 = arith.constant 5 : i32
    %222 = vector.broadcast %c5_i32 : i32 to vector<8x64xi32>
    %223 = arith.cmpi sle, %39, %222 : vector<8x64xi32>
    %c5_i32_32 = arith.constant 5 : i32
    %224 = vector.broadcast %c5_i32_32 : i32 to vector<8x64xi32>
    %225 = arith.cmpi sgt, %45, %224 : vector<8x64xi32>
    %226 = arith.andi %223, %225 : vector<8x64xi1>
    %227 = arith.select %226, %221, %197 : vector<8x64xi1>, vector<8x64xf32>
    %228 = arith.select %226, %219, %198 : vector<8x64xi1>, vector<8x64xf32>
    %229 = vector.extract_strided_slice %6 {offsets = [48, 0], sizes = [8, 256], strides = [1, 1]} : vector<64x256xf32> to vector<8x256xf32>
    %230 = vector.extract_strided_slice %6 {offsets = [8, 0], sizes = [8, 256], strides = [1, 1]} : vector<64x256xf32> to vector<8x256xf32>
    %231 = vector.shape_cast %28 : vector<1x256xi1> to vector<1x256xi1>
    %232 = vector.broadcast %231 : vector<1x256xi1> to vector<8x256xi1>
    %233 = arith.select %232, %230, %229 : vector<8x256xi1>, vector<8x256xf32>
    %cst_33 = arith.constant dense<0.000000e+00> : vector<8x256xf32>
    %234 = tpu.matmul %227, %46, %cst_33 {dimension_numbers = #tpu.dot_dimension_numbers<[1], [0], [0], [1], [0, 0, 1, 1], [], []>} : vector<8x64xf32>, vector<64x256xf32>, vector<8x256xf32> -> vector<8x256xf32>
    %235 = arith.addf %233, %234 : vector<8x256xf32>
    %236 = vector.extract_strided_slice %235 {offsets = [0, 0], sizes = [8, 192], strides = [1, 1]} : vector<8x256xf32> to vector<8x192xf32>
    %237 = arith.negf %236 : vector<8x192xf32>
    %238 = math.exp %237 : vector<8x192xf32>
    %cst_34 = arith.constant 1.000000e+00 : f32
    %239 = vector.broadcast %cst_34 : f32 to vector<8x192xf32>
    %240 = arith.addf %239, %238 : vector<8x192xf32>
    %241 = arith.divf %239, %240 : vector<8x192xf32>
    %242 = vector.extract_strided_slice %235 {offsets = [0, 192], sizes = [8, 64], strides = [1, 1]} : vector<8x256xf32> to vector<8x64xf32>
    %243 = math.tanh %242 : vector<8x64xf32>
    %244 = vector.extract_strided_slice %241 {offsets = [0, 0], sizes = [8, 64], strides = [1, 1]} : vector<8x192xf32> to vector<8x64xf32>
    %245 = vector.extract_strided_slice %241 {offsets = [0, 64], sizes = [8, 64], strides = [1, 1]} : vector<8x192xf32> to vector<8x64xf32>
    %246 = vector.extract_strided_slice %241 {offsets = [0, 128], sizes = [8, 64], strides = [1, 1]} : vector<8x192xf32> to vector<8x64xf32>
    %247 = arith.mulf %245, %228 : vector<8x64xf32>
    %248 = arith.mulf %244, %243 : vector<8x64xf32>
    %249 = arith.addf %247, %248 : vector<8x64xf32>
    %250 = math.tanh %249 : vector<8x64xf32>
    %251 = arith.mulf %246, %250 : vector<8x64xf32>
    %c6_i32 = arith.constant 6 : i32
    %252 = vector.broadcast %c6_i32 : i32 to vector<8x64xi32>
    %253 = arith.cmpi sle, %39, %252 : vector<8x64xi32>
    %c6_i32_35 = arith.constant 6 : i32
    %254 = vector.broadcast %c6_i32_35 : i32 to vector<8x64xi32>
    %255 = arith.cmpi sgt, %45, %254 : vector<8x64xi32>
    %256 = arith.andi %253, %255 : vector<8x64xi1>
    %257 = arith.select %256, %251, %227 : vector<8x64xi1>, vector<8x64xf32>
    %258 = arith.select %256, %249, %228 : vector<8x64xi1>, vector<8x64xf32>
    %259 = vector.extract_strided_slice %6 {offsets = [56, 0], sizes = [8, 256], strides = [1, 1]} : vector<64x256xf32> to vector<8x256xf32>
    %260 = vector.extract_strided_slice %6 {offsets = [0, 0], sizes = [8, 256], strides = [1, 1]} : vector<64x256xf32> to vector<8x256xf32>
    %261 = vector.shape_cast %28 : vector<1x256xi1> to vector<1x256xi1>
    %262 = vector.broadcast %261 : vector<1x256xi1> to vector<8x256xi1>
    %263 = arith.select %262, %260, %259 : vector<8x256xi1>, vector<8x256xf32>
    %cst_36 = arith.constant dense<0.000000e+00> : vector<8x256xf32>
    %264 = tpu.matmul %257, %46, %cst_36 {dimension_numbers = #tpu.dot_dimension_numbers<[1], [0], [0], [1], [0, 0, 1, 1], [], []>} : vector<8x64xf32>, vector<64x256xf32>, vector<8x256xf32> -> vector<8x256xf32>
    %265 = arith.addf %263, %264 : vector<8x256xf32>
    %266 = vector.extract_strided_slice %265 {offsets = [0, 0], sizes = [8, 192], strides = [1, 1]} : vector<8x256xf32> to vector<8x192xf32>
    %267 = arith.negf %266 : vector<8x192xf32>
    %268 = math.exp %267 : vector<8x192xf32>
    %cst_37 = arith.constant 1.000000e+00 : f32
    %269 = vector.broadcast %cst_37 : f32 to vector<8x192xf32>
    %270 = arith.addf %269, %268 : vector<8x192xf32>
    %271 = arith.divf %269, %270 : vector<8x192xf32>
    %272 = vector.extract_strided_slice %265 {offsets = [0, 192], sizes = [8, 64], strides = [1, 1]} : vector<8x256xf32> to vector<8x64xf32>
    %273 = math.tanh %272 : vector<8x64xf32>
    %274 = vector.extract_strided_slice %271 {offsets = [0, 0], sizes = [8, 64], strides = [1, 1]} : vector<8x192xf32> to vector<8x64xf32>
    %275 = vector.extract_strided_slice %271 {offsets = [0, 64], sizes = [8, 64], strides = [1, 1]} : vector<8x192xf32> to vector<8x64xf32>
    %276 = vector.extract_strided_slice %271 {offsets = [0, 128], sizes = [8, 64], strides = [1, 1]} : vector<8x192xf32> to vector<8x64xf32>
    %277 = arith.mulf %275, %258 : vector<8x64xf32>
    %278 = arith.mulf %274, %273 : vector<8x64xf32>
    %279 = arith.addf %277, %278 : vector<8x64xf32>
    %280 = math.tanh %279 : vector<8x64xf32>
    %281 = arith.mulf %276, %280 : vector<8x64xf32>
    %c7_i32 = arith.constant 7 : i32
    %282 = vector.broadcast %c7_i32 : i32 to vector<8x64xi32>
    %283 = arith.cmpi sle, %39, %282 : vector<8x64xi32>
    %c7_i32_38 = arith.constant 7 : i32
    %284 = vector.broadcast %c7_i32_38 : i32 to vector<8x64xi32>
    %285 = arith.cmpi sgt, %45, %284 : vector<8x64xi32>
    %286 = arith.andi %283, %285 : vector<8x64xi1>
    %287 = arith.select %286, %281, %257 : vector<8x64xi1>, vector<8x64xf32>
    %c0_39 = arith.constant 0 : index
    %c0_40 = arith.constant 0 : index
    %288 = vector.load %arg6[%c0_39, %c0_40] : memref<8x64xf32, #tpu.memory_space<vmem>>, vector<8x64xf32>
    tpu.vector_store %arg6[%c0_39, %c0_40], %287 {strides = array<i32>} : memref<8x64xf32, #tpu.memory_space<vmem>>, vector<8x64xf32>,
    return
  }
  func.func @transform_0(%arg0: i32) -> (i32, i32, i32) {
    %c0_i32 = arith.constant 0 : i32
    %c0_i32_0 = arith.constant 0 : i32
    %c0_i32_1 = arith.constant 0 : i32
    return %c0_i32, %arg0, %c0_i32_0 : i32, i32, i32
  }
  func.func @transform_1(%arg0: i32) -> (i32, i32) {
    %c0_i32 = arith.constant 0 : i32
    %c0_i32_0 = arith.constant 0 : i32
    return %arg0, %c0_i32 : i32, i32
  }
  func.func @transform_2(%arg0: i32) -> (i32, i32) {
    %c0_i32 = arith.constant 0 : i32
    %c0_i32_0 = arith.constant 0 : i32
    %c0_i32_1 = arith.constant 0 : i32
    return %c0_i32, %c0_i32_0 : i32, i32
  }
  func.func @transform_3(%arg0: i32) -> (i32, i32) {
    %c0_i32 = arith.constant 0 : i32
    %c0_i32_0 = arith.constant 0 : i32
    %c0_i32_1 = arith.constant 0 : i32
    return %c0_i32, %c0_i32_0 : i32, i32
  }
  func.func @transform_4(%arg0: i32) -> (i32, i32) {
    %c0_i32 = arith.constant 0 : i32
    %c0_i32_0 = arith.constant 0 : i32
    %c0_i32_1 = arith.constant 0 : i32
    return %c0_i32, %c0_i32_0 : i32, i32
  }
  func.func @transform_5(%arg0: i32) -> (i32, i32) {
    %c0_i32 = arith.constant 0 : i32
    %c0_i32_0 = arith.constant 0 : i32
    return %arg0, %c0_i32 : i32, i32
  }
}

</mosaic_0001>

<bundles_post_ra>
// kernel: tpu_custom_call.1
= control target key start
LH: loop header
LB: loop body
LE: loop exit
PB: predicated region body
PF: predicated region fallthrough
CT: control target
= control target key end

     0   :  { %10 = vsyncpa [#allocation3], 0  ;;  %s1988_s0 = inlined_call_operand.hbm [shape: f32[8,8,32], index: 0, kind: input, shape index: {}]   ;;  %s1989_s1 = inlined_call_operand.vmem [shape: s32[8,1], index: 1, kind: input, shape index: {}]   ;;  %s1990_s2 = inlined_call_operand.hbm [shape: f32[32,256], index: 2, kind: input, shape index: {}]   ;;  %s1991_s3 = inlined_call_operand.hbm [shape: f32[64,256], index: 3, kind: input, shape index: {}]   ;;  %s1992_s4 = inlined_call_operand.vmem [shape: f32[1,256], index: 4, kind: input, shape index: {}]   ;;  %s1993_s5 = inlined_call_operand.hbm [shape: f32[8,64], index: 5, kind: output, shape index: {}]  }
   0x1   :  { %11 = vsyncpa [#allocation6], 0 }
   0x2   :  { %12 = vsyncpa [#allocation4], 0  ;;  %s1492_s18 = smov [#allocation5]  }
   0x3   :  { %s32_s19 = sshll.u32 %s1492_s18, 4  ;;  %s33_s19 = int_to_ptr.vmem [resolvable:$true] %s32_s19 }
   0x4   :  { %s1414_s20 = scalar_lea.vmem %s33_s19, 1024  ;;  %p1419_p1 = scmp.lt.s32.totalorder %s33_s19, %s33_s19 }
   0x5   :  { %p1415_p0 = scmp.ne.s32.totalorder %s33_s19, %s1414_s20  ;;  %p1420_p2 = scmp.lt.s32.totalorder %s1414_s20, %s1414_s20 }
   0x7   :  { %p1421_p3 = por %p1420_p2, %p1419_p1 }
   0x9   :  { %p1422_p4 = pnand %p1421_p3, %p1415_p0 }
   0xb   :  { %1425 = shalt.err (!%p1422_p4)
}
   0xc   :  { %s1493_s21 = smov 256   ;;  %s1494_s22 = smov 16  }
   0xd   :  { %38 = dma.hbm_to_vmem [thread:$0]  %s1990_s2, 1024, %s33_s19, [#allocation6], %s1493_s21, %s1493_s21, %s1494_s22  }
   0xe   :  { %s1495_s25 = smov [#allocation2]  }
   0xf   :  { %s18_s26 = sshll.u32 %s1495_s25, 4  ;;  %s19_s26 = int_to_ptr.vmem [resolvable:$true] %s18_s26 }
  0x10   :  { %s1434_s27 = scalar_lea.vmem %s19_s26, 1024  ;;  %p1439_p6 = scmp.lt.s32.totalorder %s19_s26, %s19_s26 }
  0x11   :  { %p1435_p5 = scmp.ne.s32.totalorder %s19_s26, %s1434_s27  ;;  %p1440_p7 = scmp.lt.s32.totalorder %s1434_s27, %s1434_s27 }
  0x13   :  { %p1441_p8 = por %p1440_p7, %p1439_p6 }
  0x15   :  { %p1442_p9 = pnand %p1441_p8, %p1435_p5 }
  0x17   :  { %1445 = shalt.err (!%p1442_p9)
}
  0x18   :  { %s1496_s28 = smov 128   ;;  %s1497_s29 = smov 8  }
  0x19   :  { %24 = dma.hbm_to_vmem [thread:$0]  %s1988_s0, 1024, %s19_s26, [#allocation3], %s1496_s28, %s1496_s28, %s1497_s29  }
  0x1a   :  { %s1498_s7 = smov [#allocation7]  }
  0x1b   :  { %s44_s8 = sshll.u32 %s1498_s7, 4  ;;  %s45_s8 = int_to_ptr.vmem [resolvable:$true] %s44_s8 }
  0x1c   :  { %s1454_s2 = scalar_lea.vmem %s45_s8, 2048  ;;  %p1459_p11 = scmp.lt.s32.totalorder %s45_s8, %s45_s8 }
  0x1d   :  { %p1455_p10 = scmp.ne.s32.totalorder %s45_s8, %s1454_s2  ;;  %p1460_p12 = scmp.lt.s32.totalorder %s1454_s2, %s1454_s2 }
  0x1f   :  { %p1461_p13 = por %p1460_p12, %p1459_p11 }
  0x21   :  { %p1462_p0 = pnand %p1461_p13, %p1455_p10 }
  0x23   :  { %1465 = shalt.err (!%p1462_p0)
}
  0x24   :  { %50 = dma.hbm_to_vmem [thread:$0]  %s1991_s3, 2048, %s45_s8, [#allocation6], %s1493_s21, %s1493_s21, %s1494_s22  }
  0x25   :  { %1486 = dma.done.wait [#allocation3], 1024  }
  0x26   :  { %1487 = vsyncadd [#allocation3], 4294966272 }
  0x27   :  { %1488 = dma.done.wait [#allocation6], 3072  }
  0x28   :  { %1489 = vsyncadd [#allocation6], 4294964224  ;;  %v1499_v0 = vmov 0.0   ;;  %v77_v1 = vld [vmem:[#allocation5 + $0x38] sm:$0xff]  ;;  %v76_v2 = vld [vmem:[#allocation5 + $0x30] sm:$0xff]  ;;  %vm90_vm0 = vcmask 261120   ;;  %v80_v33 = vlaneseq }
  0x29   :  { %179 = vmatprep.mubr.f32.mxu0 %v1499_v0  ;;  %359 = vmatprep.mubr.f32.mxu1 %v1499_v0  ;;  %v75_v3 = vld [vmem:[#allocation5 + $0x28] sm:$0xff]  ;;  %v74_v4 = vld [vmem:[#allocation5 + $0x20] sm:$0xff]  ;;  %v73_v5 = vld [vmem:[#allocation5 + $0x18] sm:$0xff]  ;;  %s1501_s12 = smov 64   ;;  %vm291_vm14 = vcmask 523264  }
  0x2a   :  { %139 = vmatprep.subr.mxu0 %v77_v1  ;;  %v72_v6 = vld [vmem:[#allocation5 + $0x10] sm:$0xff]  ;;  %v71_v7 = vld [vmem:[#allocation5 + $0x8] sm:$0xff]  ;;  %v1544_v8 = vld [vmem:[#allocation7 + $0x78] sm:$0xff]  ;;  %v81_v34 = vshrl.u32 %v80_v33, 7  ;;  %v1649_v43 = vand.u32 127, %v80_v33 }
  0x2b   :  { %140 = vmatpush1.msra.mxu0 %v76_v2  ;;  %v1546_v9 = vld [vmem:[#allocation7 + $0x70] sm:$0xff]  ;;  %v1548_v10 = vld [vmem:[#allocation7 + $0x68] sm:$0xff]  ;;  %v70_v11 = vld [vmem:[#allocation5] sm:$0xff]  ;;  %311 = vmatprep.subr.mxu1 %v1544_v8 }
  0x2c   :  { %141 = vmatprep.subr.mxu0 %v75_v3  ;;  %v1551_v12 = vld [vmem:[#allocation7 + $0x60] sm:$0xff]  ;;  %312 = vmatpush1.msra.mxu1 %v1546_v9  ;;  %v1554_v14 = vld [vmem:[#allocation7 + $0x58] sm:$0xff]  ;;  %v1557_v15 = vld [vmem:[#allocation7 + $0x50] sm:$0xff]  ;;  %v82_v35 = vsub.s32 0, %v81_v34  ;;  %v86_v40 = vsub.s32 1, %v81_v34  ;;  %v231_v49 = vadd.s32 128, %v1649_v43 }
  0x2d   :  { %142 = vmatpush1.msra.mxu0 %v74_v4  ;;  %v62_v13 = vld [vmem:[#allocation2] sm:$0xff]  ;;  %313 = vmatprep.subr.mxu1 %v1548_v10  ;;  %v1560_v16 = vld [vmem:[#allocation7 + $0x48] sm:$0xff]  ;;  %v1568_v19 = vld [vmem:[#allocation7 + $0x38] sm:$0xff]  ;;  %vm232_vm1 = vcmp.ge.s32.totalorder %v1649_v43, 32  ;;  %vm234_vm2 = vcmp.lt.s32.totalorder %v1649_v43, 64  ;;  %vm238_vm6 = vcmp.ge.s32.totalorder %v1649_v43, 96 }
  0x2e   :  { %143 = vmatprep.subr.mxu0 %v73_v5  ;;  %314 = vmatpush1.msra.mxu1 %v1551_v12  ;;  %v1564_v17 = vld [vmem:[#allocation7 + $0x40] sm:$0xff]  ;;  %v63_v18 = vld [vmem:[#allocation2 + $0x8] sm:$0xff]  ;;  %v1571_v20 = vld [vmem:[#allocation7 + $0x30] sm:$0xff]  ;;  %vm247_vm3 = vcmp.ge.s32.totalorder %v231_v49, 160  ;;  %vm249_vm4 = vcmp.lt.s32.totalorder %v231_v49, 192  ;;  %vm255_vm8 = vcmp.ge.s32.totalorder %v231_v49, 224 }
  0x2f   :  { %144 = vmatpush1.msra.mxu0 %v72_v6  ;;  %315 = vmatprep.subr.mxu1 %v1554_v14  ;;  %v1575_v21 = vld [vmem:[#allocation7 + $0x28] sm:$0xff]  ;;  %v1580_v22 = vld [vmem:[#allocation7 + $0x20] sm:$0xff]  ;;  %v64_v23 = vld [vmem:[#allocation2 + $0x10] sm:$0xff] }
  0x30   :  { %145 = vmatprep.subr.mxu0 %v71_v7  ;;  %316 = vmatpush1.msra.mxu1 %v1557_v15  ;;  %v1584_v24 = vld [vmem:[#allocation7 + $0x18] sm:$0xff]  ;;  %v1587_v25 = vld [vmem:[#allocation7 + $0x10] sm:$0xff]  ;;  %v1591_v26 = vld [vmem:[#allocation7 + $0x8] sm:$0xff] }
  0x31   :  { %146 = vmatpush1.msra.mxu0 %v70_v11  ;;  %317 = vmatprep.subr.mxu1 %v1560_v16  ;;  %v1596_v27 = vld [vmem:[#allocation7] sm:$0xff]  ;;  %v65_v28 = vld [vmem:[#allocation2 + $0x18] sm:$0xff]  ;;  %v67_v30 = vld [vmem:[#allocation2 + $0x28] sm:$0xff] }
  0x32   :  { %1266 = vmatmul.mubr.msk.f32.vlgmr.msra.gmra.mxu0 %vm90_vm0, %v62_v13  ;;  %549 = vmatprep.subr.mxu0 %v1544_v8  ;;  %v66_v29 = vld [vmem:[#allocation2 + $0x20] sm:$0xff]  ;;  %v68_v31 = vld [vmem:[#allocation2 + $0x30] sm:$0xff]  ;;  %v69_v32 = vld [vmem:[#allocation2 + $0x38] sm:$0xff] }
  0x33   :  { %185 = vmatprep.mubr.f32.mxu0 %v1499_v0  ;;  %318 = vmatpush1.msra.mxu1 %v1564_v17  ;;  %v78_v36 = vld [vmem:[%s1992_s4] sm:$0x3]  ;;  %vm236_vm5 = vmand %vm232_vm1, %vm234_vm2 }
  0x34   :  { %550 = vmatpush1.msra.mxu0 %v1546_v9  ;;  %319 = vmatprep.subr.mxu1 %v1568_v19  ;;  %v83_v37 = vrot.slane %v78_v36, %v82_v35  ;;  %v87_v44 = vrot.slane %v78_v36, %v86_v40  ;;  %vm251_vm7 = vmand %vm247_vm3, %vm249_vm4 }
  0x35   :  { %320 = vmatpush1.msra.mxu1 %v1571_v20  ;;  %551 = vmatprep.subr.mxu0 %v1548_v10  ;;  %vm1669_vm9 = vmor %vm236_vm5, %vm238_vm6 }
  0x36   :  { %1267 = vmatmul.mubr.msk.f32.gmra.mxu0 %vm90_vm0, %v63_v18  ;;  %321 = vmatprep.subr.mxu1 %v1575_v21  ;;  %vm1675_vm10 = vmor %vm251_vm7, %vm255_vm8 }
  0x37   :  { %191 = vmatprep.mubr.f32.mxu0 %v1499_v0  ;;  %322 = vmatpush1.msra.mxu1 %v1580_v22 }
  0x38   :  { %552 = vmatpush1.msra.mxu0 %v1551_v12  ;;  %323 = vmatprep.subr.mxu1 %v1584_v24 }
  0x39   :  { %324 = vmatpush1.msra.mxu1 %v1587_v25  ;;  %553 = vmatprep.subr.mxu0 %v1554_v14 }
  0x3a   :  { %1268 = vmatmul.mubr.msk.f32.gmra.mxu0 %vm90_vm0, %v64_v23  ;;  %325 = vmatprep.subr.mxu1 %v1591_v26 }
  0x3b   :  { %197 = vmatprep.mubr.f32.mxu0 %v1499_v0  ;;  %326 = vmatpush1.msra.mxu1 %v1596_v27 }
  0x3c   :  { %554 = vmatpush1.msra.mxu0 %v1557_v15  ;;  %360 = vmatmul.mubr.f32.vlgmr.msra.gmra.mxu1 %v1499_v0 }
  0x3d   :  { %428 = vmatprep.subr.mxu1 %v1544_v8  ;;  %476 = vmatprep.mubr.f32.mxu1 %v1499_v0 }
  0x3e   :  { %1269 = vmatmul.mubr.msk.f32.gmra.mxu0 %vm90_vm0, %v65_v28  ;;  %429 = vmatpush1.msra.mxu1 %v1546_v9 }
  0x3f   :  { %203 = vmatprep.mubr.f32.mxu0 %v1499_v0  ;;  %430 = vmatprep.subr.mxu1 %v1548_v10 }
  0x40   :  { %555 = vmatprep.subr.mxu0 %v1560_v16  ;;  %431 = vmatpush1.msra.mxu1 %v1551_v12 }
  0x41   :  { %432 = vmatprep.subr.mxu1 %v1554_v14  ;;  %556 = vmatpush1.msra.mxu0 %v1564_v17 }
  0x42   :  { %1270 = vmatmul.mubr.msk.f32.gmra.mxu0 %vm90_vm0, %v66_v29  ;;  %433 = vmatpush1.msra.mxu1 %v1557_v15 }
  0x43   :  { %209 = vmatprep.mubr.f32.mxu0 %v1499_v0  ;;  %434 = vmatprep.subr.mxu1 %v1560_v16 }
  0x44   :  { %557 = vmatprep.subr.mxu0 %v1568_v19  ;;  %435 = vmatpush1.msra.mxu1 %v1564_v17 }
  0x45   :  { %436 = vmatprep.subr.mxu1 %v1568_v19  ;;  %558 = vmatpush1.msra.mxu0 %v1571_v20 }
  0x46   :  { %1271 = vmatmul.mubr.msk.f32.gmra.mxu0 %vm90_vm0, %v67_v30  ;;  %437 = vmatpush1.msra.mxu1 %v1571_v20 }
  0x47   :  { %215 = vmatprep.mubr.f32.mxu0 %v1499_v0  ;;  %438 = vmatprep.subr.mxu1 %v1575_v21 }
  0x48   :  { %559 = vmatprep.subr.mxu0 %v1575_v21  ;;  %439 = vmatpush1.msra.mxu1 %v1580_v22 }
  0x49   :  { %440 = vmatprep.subr.mxu1 %v1584_v24  ;;  %560 = vmatpush1.msra.mxu0 %v1580_v22 }
  0x4a   :  { %1272 = vmatmul.mubr.msk.f32.gmra.mxu0 %vm90_vm0, %v68_v31  ;;  %441 = vmatpush1.msra.mxu1 %v1587_v25 }
  0x4b   :  { %221 = vmatprep.mubr.f32.mxu0 %v1499_v0  ;;  %442 = vmatprep.subr.mxu1 %v1591_v26 }
  0x4c   :  { %561 = vmatprep.subr.mxu0 %v1584_v24  ;;  %443 = vmatpush1.msra.mxu1 %v1596_v27 }
  0x4d   :  { %562 = vmatpush1.msra.mxu0 %v1587_v25  ;;  %670 = vmatprep.subr.mxu1 %v1544_v8 }
  0x4e   :  { %1273 = vmatmul.mubr.msk.f32.gmra.mxu0 %vm90_vm0, %v69_v32  ;;  %563 = vmatprep.subr.mxu0 %v1591_v26 }
  0x4f   :  { %597 = vmatprep.mubr.f32.mxu0 %v1499_v0  ;;  %564 = vmatpush1.msra.mxu0 %v1596_v27 }
  0x50   :  { %791 = vmatprep.subr.mxu0 %v1544_v8 }
  0xf2   :  { %v181_v38 = vpop.f32.mrf.mxu0 }
  0xf3   :  { %v1647_v39 = vadd.f32 %v181_v38, %v83_v37 }
  0xf4   :  { %v183_v41 = vpop.f32.mrf.mxu0 }
  0xf6   :  { %v187_v42 = vpop.f32.mrf.mxu0 }
  0xf7   :  { %v1651_v45 = vadd.f32 %v187_v42, %v83_v37 }
  0xf8   :  { %v189_v46 = vpop.f32.mrf.mxu0 }
  0xf9   :  { %v1653_v47 = vadd.f32 %v189_v46, %v87_v44  ;;  %v1739_v46 = vadd.f32 %v183_v41, %v87_v44 }
  0xfa   :  { %v193_v48 = vpop.f32.mrf.mxu0 }
  0xfb   :  { %v1656_v50 = vadd.f32 %v193_v48, %v83_v37 }
  0xfc   :  { %v195_v51 = vpop.f32.mrf.mxu0  ;;  %v361_v36 = vpop.f32.mrf.mxu1 }
  0xfd   :  { %v1660_v52 = vadd.f32 %v195_v51, %v87_v44 }
  0xfe   :  { %v199_v53 = vpop.f32.mrf.mxu0  ;;  %v363_v41 = vpop.f32.mrf.mxu1 }
  0xff   :  { %v1662_v54 = vadd.f32 %v199_v53, %v83_v37 }
 0x100   :  { %v201_v55 = vpop.f32.mrf.mxu0 }
 0x101   :  { %v1667_v56 = vadd.f32 %v201_v55, %v87_v44 }
 0x102   :  { %v205_v57 = vpop.f32.mrf.mxu0 }
 0x103   :  { %v1673_v59 = vadd.f32 %v205_v57, %v83_v37 }
 0x104   :  { %v207_v60 = vpop.f32.mrf.mxu0 }
 0x105   :  { %v1679_v62 = vadd.f32 %v207_v60, %v87_v44  ;;  %v649_v63 = vsel %vm1669_vm9, %v1673_v59, %v1662_v54  ;;  %v770_v1 = vsel %vm1669_vm9, %v1662_v54, %v1673_v59  ;;  %v1500_v60 = vmov 0  }
 0x106   :  { %v211_v2 = vpop.f32.mrf.mxu0  ;;  %1308 = vset.pattern.permute.xlu1 %v1500_v60  ;;  %1309 = vset.pattern.permute.xlu0 %v1500_v60 }
 0x107   :  { %v1689_v3 = vadd.f32 %v211_v2, %v83_v37  ;;  %v650_v4 = vsel %vm1675_vm10, %v1679_v62, %v1667_v56  ;;  %v771_v5 = vsel %vm1675_vm10, %v1667_v56, %v1679_v62 }
 0x108   :  { %v213_v6 = vpop.f32.mrf.mxu0 }
 0x109   :  { %v1699_v7 = vadd.f32 %v213_v6, %v87_v44  ;;  %v528_v11 = vsel %vm1669_vm9, %v1689_v3, %v1656_v50  ;;  %v891_v13 = vsel %vm1669_vm9, %v1656_v50, %v1689_v3 }
 0x10a   :  { %v217_v18 = vpop.f32.mrf.mxu0 }
 0x10b   :  { %v1709_v23 = vadd.f32 %v217_v18, %v83_v37  ;;  %v529_v28 = vsel %vm1675_vm10, %v1699_v7, %v1660_v52  ;;  %v892_v29 = vsel %vm1675_vm10, %v1660_v52, %v1699_v7 }
 0x10c   :  { %v219_v30 = vpop.f32.mrf.mxu0 }
 0x10d   :  { %v1719_v31 = vadd.f32 %v219_v30, %v87_v44  ;;  %v407_v32 = vsel %vm1669_vm9, %v1709_v23, %v1651_v45  ;;  %v1012_v33 = vsel %vm1669_vm9, %v1651_v45, %v1709_v23 }
 0x10e   :  { %v223_v34 = vpop.f32.mrf.mxu0 }
 0x10f   :  { %v1729_v35 = vadd.f32 %v223_v34, %v83_v37  ;;  %v408_v38 = vsel %vm1675_vm10, %v1719_v31, %v1653_v47  ;;  %v1013_v40 = vsel %vm1675_vm10, %v1653_v47, %v1719_v31 }
 0x110   :  { %v225_v42 = vpop.f32.mrf.mxu0 }
 0x111   :  { %v289_v37 = vsel %vm1669_vm9, %v1729_v35, %v1647_v39  ;;  %v1745_v48 = vadd.f32 %v225_v42, %v87_v44  ;;  %v228_v44 = vld [vmem:[%s1989_s1] sm:$0xff]  ;;  %s1502_s1 = smov [#allocation8]  }
 0x112   :  { %v366_v51 = vadd.f32 %v361_v36, %v289_v37  ;;  %v258_v2 = vsub.s32 8, %v228_v44  ;;  %s1256_s13 = sshll.u32 %s1502_s1, 4  ;;  %s1257_s13 = int_to_ptr.vmem [resolvable:$true] %s1256_s13 }
 0x113   :  { %v290_v53 = vsel %vm1675_vm10, %v1745_v48, %v1739_v46  ;;  %s1466_s14 = scalar_lea.vmem %s1257_s13, 128  ;;  %p1471_p2 = scmp.lt.s32.totalorder %s1257_s13, %s1257_s13 }
 0x114   :  { %v367_v57 = vadd.f32 %v363_v41, %v290_v53  ;;  %262 = vperm.xlu1 %1308, %v258_v2   ;;  %v1274_v18 = vmul.f32 -1.442695, %v366_v51  ;;  %p1467_p1 = scmp.ne.s32.totalorder %s1257_s13, %s1466_s14  ;;  %p1472_p3 = scmp.lt.s32.totalorder %s1466_s14, %s1466_s14 }
 0x116   :  { %1310 = vtanh.f32 %v367_v57  ;;  %v1275_v60 = vmul.f32 -1.442695, %v367_v57  ;;  %p1473_p4 = por %p1472_p3, %p1471_p2 }
 0x117   :  { %1312 = vpow2.f32 %v1274_v18 }
 0x118   :  { %266 = vperm.xlu1 %1308, %v228_v44   ;;  %p1474_p5 = pnand %p1473_p4, %p1467_p1 }
 0x123   :  { %v1311_v6 = vpop.eup %1310 }
 0x124   :  { %383 = vrot.lane.b32.xlu0 %v1311_v6, %s1501_s12  ;;  %v1313_v30 = vpop.eup %1312 }
 0x125   :  { %v374_v34 = vadd.f32 1.0, %v1313_v30 }
 0x127   :  { %1314 = vrcp.f32 %v374_v34 }
 0x134   :  { %v1315_v36 = vpop.eup %1314 }
 0x135   :  { %v381_v53 = vmul.f32 0.0, %v1315_v36 }
 0x18f   :  { %v263_v51 = vpop.permute.xlu1 %262 }
 0x190   :  { %v1768_v6 = vsel %vm232_vm1, %v263_v51, 0 }
 0x191   :  { %vm398_vm11 = vcmp.le.s32.totalorder %v1768_v6, 0  ;;  %vm519_vm15 = vcmp.le.s32.totalorder %v1768_v6, 1  ;;  %vm640_vm2 = vcmp.le.s32.totalorder %v1768_v6, 2  ;;  %vm761_vm5 = vcmp.le.s32.totalorder %v1768_v6, 3 }
 0x192   :  { %vm882_vm8 = vcmp.le.s32.totalorder %v1768_v6, 4 }
 0x193   :  { %v267_v2 = vpop.permute.xlu1 %266 }
 0x194   :  { %v1772_v18 = vsel %vm232_vm1, 8, %v267_v2 }
 0x195   :  { %vm399_vm12 = vcmp.gt.s32.totalorder %v1772_v18, 0  ;;  %vm520_vm0 = vcmp.gt.s32.totalorder %v1772_v18, 1  ;;  %vm641_vm3 = vcmp.gt.s32.totalorder %v1772_v18, 2  ;;  %vm762_vm6 = vcmp.gt.s32.totalorder %v1772_v18, 3 }
 0x196   :  { %v384_v42 = vpop.permute.xlu0 %383  ;;  %vm400_vm13 = vmand %vm398_vm11, %vm399_vm12  ;;  %vm883_vm11 = vcmp.gt.s32.totalorder %v1772_v18, 4 }
 0x197   :  { %v386_v37 = vmul.f32 %v1315_v36, %v384_v42  ;;  %vm521_vm1 = vmand %vm519_vm15, %vm520_vm0  ;;  %vm1004_vm15 = vcmp.gt.s32.totalorder %v1772_v18, 5 }
 0x198   :  { %vm642_vm4 = vmand %vm640_vm2, %vm641_vm3  ;;  %vm1125_vm2 = vcmp.gt.s32.totalorder %v1772_v18, 6 }
 0x199   :  { %388 = vrot.lane.b32.xlu0 %v386_v37, %s1501_s12  ;;  %vm763_vm7 = vmand %vm761_vm5, %vm762_vm6 }
 0x19a   :  { %vm884_vm12 = vmand %vm882_vm8, %vm883_vm11 }
 0x20b   :  { %v389_v41 = vpop.permute.xlu0 %388 }
 0x20c   :  { %v391_v55 = vadd.f32 %v389_v41, %v381_v53 }
 0x20e   :  { %1316 = vtanh.f32 %v391_v55  ;;  %403 = vrot.lane.b32.xlu1 %v391_v55, %s1501_s12 }
 0x20f   :  { %1318 = vpow2.f32 %v1275_v60 }
 0x21b   :  { %v1317_v44 = vpop.eup %1316 }
 0x21c   :  { %394 = vrot.lane.b32.xlu0 %v1317_v44, %s1501_s12  ;;  %v1319_v30 = vpop.eup %1318 }
 0x21d   :  { %v375_v55 = vadd.f32 1.0, %v1319_v30 }
 0x21f   :  { %1320 = vrcp.f32 %v375_v55 }
 0x22c   :  { %v1321_v36 = vpop.eup %1320 }
 0x280   :  { %v404_v34 = vpop.permute.xlu1 %403 }
 0x281   :  { %v406_v57 = vsel %vm400_vm13, %v404_v34, 0.0 }
 0x282   :  { %499 = vrot.lane.b32.xlu1 %v406_v57, %s1501_s12 }
 0x28e   :  { %v395_v42 = vpop.permute.xlu0 %394 }
 0x28f   :  { %v397_v37 = vmul.f32 %v1321_v36, %v395_v42 }
 0x291   :  { %v401_v53 = vsel %vm400_vm13, %v397_v37, 0.0  ;;  %vm1003_vm13 = vcmp.le.s32.totalorder %v1768_v6, 5 }
 0x292   :  { %1276 = vmatmul.mubr.msk.f32.vlgmr.msra.gmra.mxu1 %vm291_vm14, %v401_v53  ;;  %vm1005_vm0 = vmand %vm1003_vm13, %vm1004_vm15 }
 0x293   :  { %671 = vmatpush1.msra.mxu1 %v1546_v9  ;;  %718 = vmatprep.mubr.f32.mxu1 %v1499_v0 }
 0x294   :  { %672 = vmatprep.subr.mxu1 %v1548_v10 }
 0x295   :  { %673 = vmatpush1.msra.mxu1 %v1551_v12 }
 0x296   :  { %674 = vmatprep.subr.mxu1 %v1554_v14 }
 0x297   :  { %675 = vmatpush1.msra.mxu1 %v1557_v15 }
 0x298   :  { %676 = vmatprep.subr.mxu1 %v1560_v16 }
 0x299   :  { %677 = vmatpush1.msra.mxu1 %v1564_v17 }
 0x29a   :  { %678 = vmatprep.subr.mxu1 %v1568_v19 }
 0x29b   :  { %679 = vmatpush1.msra.mxu1 %v1571_v20 }
 0x29c   :  { %680 = vmatprep.subr.mxu1 %v1575_v21 }
 0x29d   :  { %681 = vmatpush1.msra.mxu1 %v1580_v22 }
 0x29e   :  { %682 = vmatprep.subr.mxu1 %v1584_v24 }
 0x29f   :  { %683 = vmatpush1.msra.mxu1 %v1587_v25 }
 0x2a0   :  { %684 = vmatprep.subr.mxu1 %v1591_v26 }
 0x2a1   :  { %685 = vmatpush1.msra.mxu1 %v1596_v27 }
 0x2a2   :  { %912 = vmatprep.subr.mxu1 %v1544_v8 }
 0x352   :  { %v478_v43 = vpop.f32.mrf.mxu1 }
 0x353   :  { %v483_v41 = vadd.f32 %v478_v43, %v407_v32  ;;  %v500_v32 = vpop.permute.xlu1 %499 }
 0x354   :  { %v480_v44 = vpop.f32.mrf.mxu1 }
 0x355   :  { %v484_v60 = vadd.f32 %v480_v44, %v408_v38  ;;  %v1277_v2 = vmul.f32 -1.442695, %v483_v41 }
 0x357   :  { %1322 = vtanh.f32 %v484_v60  ;;  %v1278_v41 = vmul.f32 -1.442695, %v484_v60 }
 0x358   :  { %1324 = vpow2.f32 %v1277_v2 }
 0x364   :  { %v1323_v51 = vpop.eup %1322 }
 0x365   :  { %504 = vrot.lane.b32.xlu0 %v1323_v51, %s1501_s12  ;;  %v1325_v30 = vpop.eup %1324 }
 0x366   :  { %v491_v55 = vadd.f32 1.0, %v1325_v30 }
 0x368   :  { %1326 = vrcp.f32 %v491_v55 }
 0x375   :  { %v1327_v34 = vpop.eup %1326 }
 0x376   :  { %v502_v37 = vmul.f32 %v1327_v34, %v500_v32 }
 0x3d7   :  { %v505_v36 = vpop.permute.xlu0 %504 }
 0x3d8   :  { %v507_v42 = vmul.f32 %v1327_v34, %v505_v36 }
 0x3da   :  { %509 = vrot.lane.b32.xlu0 %v507_v42, %s1501_s12 }
 0x44c   :  { %v510_v43 = vpop.permute.xlu0 %509 }
 0x44d   :  { %v512_v49 = vadd.f32 %v510_v43, %v502_v37 }
 0x44f   :  { %1328 = vtanh.f32 %v512_v49  ;;  %524 = vrot.lane.b32.xlu0 %v512_v49, %s1501_s12 }
 0x450   :  { %1330 = vpow2.f32 %v1278_v41 }
 0x45c   :  { %v1329_v38 = vpop.eup %1328 }
 0x45d   :  { %515 = vrot.lane.b32.xlu1 %v1329_v38, %s1501_s12  ;;  %v1331_v44 = vpop.eup %1330 }
 0x45e   :  { %v492_v51 = vadd.f32 1.0, %v1331_v44 }
 0x460   :  { %1332 = vrcp.f32 %v492_v51 }
 0x46d   :  { %v1333_v55 = vpop.eup %1332 }
 0x4c1   :  { %v525_v2 = vpop.permute.xlu0 %524 }
 0x4c2   :  { %v527_v30 = vsel %vm521_vm1, %v525_v2, %v406_v57 }
 0x4c3   :  { %620 = vrot.lane.b32.xlu0 %v527_v30, %s1501_s12 }
 0x4cf   :  { %v516_v34 = vpop.permute.xlu1 %515 }
 0x4d0   :  { %v518_v49 = vmul.f32 %v1333_v55, %v516_v34 }
 0x4d2   :  { %v522_v36 = vsel %vm521_vm1, %v518_v49, %v401_v53  ;;  %vm1124_vm1 = vcmp.le.s32.totalorder %v1768_v6, 6 }
 0x4d3   :  { %1279 = vmatmul.mubr.msk.f32.vlgmr.msra.gmra.mxu0 %vm291_vm14, %v522_v36  ;;  %vm1126_vm3 = vmand %vm1124_vm1, %vm1125_vm2 }
 0x4d4   :  { %792 = vmatpush1.msra.mxu0 %v1546_v9  ;;  %839 = vmatprep.mubr.f32.mxu0 %v1499_v0 }
 0x4d5   :  { %793 = vmatprep.subr.mxu0 %v1548_v10 }
 0x4d6   :  { %794 = vmatpush1.msra.mxu0 %v1551_v12 }
 0x4d7   :  { %795 = vmatprep.subr.mxu0 %v1554_v14 }
 0x4d8   :  { %796 = vmatpush1.msra.mxu0 %v1557_v15 }
 0x4d9   :  { %797 = vmatprep.subr.mxu0 %v1560_v16 }
 0x4da   :  { %798 = vmatpush1.msra.mxu0 %v1564_v17 }
 0x4db   :  { %799 = vmatprep.subr.mxu0 %v1568_v19 }
 0x4dc   :  { %800 = vmatpush1.msra.mxu0 %v1571_v20 }
 0x4dd   :  { %801 = vmatprep.subr.mxu0 %v1575_v21 }
 0x4de   :  { %802 = vmatpush1.msra.mxu0 %v1580_v22 }
 0x4df   :  { %803 = vmatprep.subr.mxu0 %v1584_v24 }
 0x4e0   :  { %804 = vmatpush1.msra.mxu0 %v1587_v25 }
 0x4e1   :  { %805 = vmatprep.subr.mxu0 %v1591_v26 }
 0x4e2   :  { %806 = vmatpush1.msra.mxu0 %v1596_v27 }
 0x4e3   :  { %1033 = vmatprep.subr.mxu0 %v1544_v8 }
 0x593   :  { %v599_v57 = vpop.f32.mrf.mxu0 }
 0x594   :  { %v604_v53 = vadd.f32 %v599_v57, %v528_v11  ;;  %v621_v11 = vpop.permute.xlu0 %620 }
 0x595   :  { %v601_v60 = vpop.f32.mrf.mxu0 }
 0x596   :  { %v605_v42 = vadd.f32 %v601_v60, %v529_v28  ;;  %v1280_v37 = vmul.f32 -1.442695, %v604_v53 }
 0x598   :  { %1334 = vtanh.f32 %v605_v42  ;;  %v1281_v49 = vmul.f32 -1.442695, %v605_v42 }
 0x599   :  { %1336 = vpow2.f32 %v1280_v37 }
 0x5a5   :  { %v1335_v32 = vpop.eup %1334 }
 0x5a6   :  { %625 = vrot.lane.b32.xlu1 %v1335_v32, %s1501_s12  ;;  %v1337_v43 = vpop.eup %1336 }
 0x5a7   :  { %v612_v38 = vadd.f32 1.0, %v1337_v43 }
 0x5a9   :  { %1338 = vrcp.f32 %v612_v38 }
 0x5b6   :  { %v1339_v41 = vpop.eup %1338 }
 0x5b7   :  { %v623_v2 = vmul.f32 %v1339_v41, %v621_v11 }
 0x618   :  { %v626_v44 = vpop.permute.xlu1 %625 }
 0x619   :  { %v628_v51 = vmul.f32 %v1339_v41, %v626_v44 }
 0x61b   :  { %630 = vrot.lane.b32.xlu1 %v628_v51, %s1501_s12 }
 0x68d   :  { %v631_v55 = vpop.permute.xlu1 %630 }
 0x68e   :  { %v633_v34 = vadd.f32 %v631_v55, %v623_v2 }
 0x690   :  { %1340 = vtanh.f32 %v633_v34  ;;  %645 = vrot.lane.b32.xlu1 %v633_v34, %s1501_s12 }
 0x691   :  { %1342 = vpow2.f32 %v1281_v49 }
 0x69d   :  { %v1341_v28 = vpop.eup %1340 }
 0x69e   :  { %636 = vrot.lane.b32.xlu0 %v1341_v28, %s1501_s12  ;;  %v1343_v57 = vpop.eup %1342 }
 0x69f   :  { %v613_v53 = vadd.f32 1.0, %v1343_v57 }
 0x6a1   :  { %1344 = vrcp.f32 %v613_v53 }
 0x6ae   :  { %v1345_v37 = vpop.eup %1344 }
 0x702   :  { %v646_v60 = vpop.permute.xlu1 %645 }
 0x703   :  { %v648_v32 = vsel %vm642_vm4, %v646_v60, %v527_v30 }
 0x704   :  { %741 = vrot.lane.b32.xlu1 %v648_v32, %s1501_s12 }
 0x710   :  { %v637_v43 = vpop.permute.xlu0 %636 }
 0x711   :  { %v639_v38 = vmul.f32 %v1345_v37, %v637_v43 }
 0x713   :  { %v643_v41 = vsel %vm642_vm4, %v639_v38, %v522_v36 }
 0x714   :  { %1282 = vmatmul.mubr.msk.f32.vlgmr.msra.gmra.mxu1 %vm291_vm14, %v643_v41 }
 0x715   :  { %913 = vmatpush1.msra.mxu1 %v1546_v9  ;;  %960 = vmatprep.mubr.f32.mxu1 %v1499_v0 }
 0x716   :  { %914 = vmatprep.subr.mxu1 %v1548_v10 }
 0x717   :  { %915 = vmatpush1.msra.mxu1 %v1551_v12 }
 0x718   :  { %916 = vmatprep.subr.mxu1 %v1554_v14 }
 0x719   :  { %917 = vmatpush1.msra.mxu1 %v1557_v15 }
 0x71a   :  { %918 = vmatprep.subr.mxu1 %v1560_v16 }
 0x71b   :  { %919 = vmatpush1.msra.mxu1 %v1564_v17 }
 0x71c   :  { %920 = vmatprep.subr.mxu1 %v1568_v19 }
 0x71d   :  { %921 = vmatpush1.msra.mxu1 %v1571_v20 }
 0x71e   :  { %922 = vmatprep.subr.mxu1 %v1575_v21 }
 0x71f   :  { %923 = vmatpush1.msra.mxu1 %v1580_v22 }
 0x720   :  { %924 = vmatprep.subr.mxu1 %v1584_v24 }
 0x721   :  { %925 = vmatpush1.msra.mxu1 %v1587_v25 }
 0x722   :  { %926 = vmatprep.subr.mxu1 %v1591_v26 }
 0x723   :  { %927 = vmatpush1.msra.mxu1 %v1596_v27 }
 0x724   :  { %1154 = vmatprep.subr.mxu1 %v1544_v8 }
 0x7d4   :  { %v720_v30 = vpop.f32.mrf.mxu1 }
 0x7d5   :  { %v725_v36 = vadd.f32 %v720_v30, %v649_v63  ;;  %v742_v63 = vpop.permute.xlu1 %741 }
 0x7d6   :  { %v722_v42 = vpop.f32.mrf.mxu1 }
 0x7d7   :  { %v726_v44 = vadd.f32 %v722_v42, %v650_v4  ;;  %v1283_v11 = vmul.f32 -1.442695, %v725_v36 }
 0x7d9   :  { %1346 = vtanh.f32 %v726_v44  ;;  %v1284_v60 = vmul.f32 -1.442695, %v726_v44 }
 0x7da   :  { %1348 = vpow2.f32 %v1283_v11 }
 0x7e6   :  { %v1347_v51 = vpop.eup %1346 }
 0x7e7   :  { %746 = vrot.lane.b32.xlu0 %v1347_v51, %s1501_s12  ;;  %v1349_v8 = vpop.eup %1348 }
 0x7e8   :  { %v733_v2 = vadd.f32 1.0, %v1349_v8 }
 0x7ea   :  { %1350 = vrcp.f32 %v733_v2 }
 0x7f7   :  { %v1351_v55 = vpop.eup %1350 }
 0x7f8   :  { %v744_v49 = vmul.f32 %v1351_v55, %v742_v63 }
 0x859   :  { %v747_v34 = vpop.permute.xlu0 %746 }
 0x85a   :  { %v749_v28 = vmul.f32 %v1351_v55, %v747_v34 }
 0x85c   :  { %751 = vrot.lane.b32.xlu0 %v749_v28, %s1501_s12 }
 0x8ce   :  { %v752_v57 = vpop.permute.xlu0 %751 }
 0x8cf   :  { %v754_v53 = vadd.f32 %v752_v57, %v744_v49 }
 0x8d1   :  { %1352 = vtanh.f32 %v754_v53  ;;  %766 = vrot.lane.b32.xlu0 %v754_v53, %s1501_s12 }
 0x8d2   :  { %1354 = vpow2.f32 %v1284_v60 }
 0x8de   :  { %v1353_v4 = vpop.eup %1352 }
 0x8df   :  { %757 = vrot.lane.b32.xlu1 %v1353_v4, %s1501_s12  ;;  %v1355_v37 = vpop.eup %1354 }
 0x8e0   :  { %v734_v43 = vadd.f32 1.0, %v1355_v37 }
 0x8e2   :  { %1356 = vrcp.f32 %v734_v43 }
 0x8ef   :  { %v1357_v36 = vpop.eup %1356 }
 0x943   :  { %v767_v38 = vpop.permute.xlu0 %766 }
 0x944   :  { %v769_v30 = vsel %vm763_vm7, %v767_v38, %v648_v32 }
 0x945   :  { %862 = vrot.lane.b32.xlu0 %v769_v30, %s1501_s12 }
 0x951   :  { %v758_v42 = vpop.permute.xlu1 %757 }
 0x952   :  { %v760_v51 = vmul.f32 %v1357_v36, %v758_v42 }
 0x954   :  { %v764_v11 = vsel %vm763_vm7, %v760_v51, %v643_v41 }
 0x955   :  { %1285 = vmatmul.mubr.msk.f32.vlgmr.msra.gmra.mxu0 %vm291_vm14, %v764_v11 }
 0x956   :  { %1034 = vmatpush1.msra.mxu0 %v1546_v9  ;;  %1081 = vmatprep.mubr.f32.mxu0 %v1499_v0 }
 0x957   :  { %1035 = vmatprep.subr.mxu0 %v1548_v10 }
 0x958   :  { %1036 = vmatpush1.msra.mxu0 %v1551_v12 }
 0x959   :  { %1037 = vmatprep.subr.mxu0 %v1554_v14 }
 0x95a   :  { %1038 = vmatpush1.msra.mxu0 %v1557_v15 }
 0x95b   :  { %1039 = vmatprep.subr.mxu0 %v1560_v16 }
 0x95c   :  { %1040 = vmatpush1.msra.mxu0 %v1564_v17 }
 0x95d   :  { %1041 = vmatprep.subr.mxu0 %v1568_v19 }
 0x95e   :  { %1042 = vmatpush1.msra.mxu0 %v1571_v20 }
 0x95f   :  { %1043 = vmatprep.subr.mxu0 %v1575_v21 }
 0x960   :  { %1044 = vmatpush1.msra.mxu0 %v1580_v22 }
 0x961   :  { %1045 = vmatprep.subr.mxu0 %v1584_v24 }
 0x962   :  { %1046 = vmatpush1.msra.mxu0 %v1587_v25 }
 0x963   :  { %1047 = vmatprep.subr.mxu0 %v1591_v26 }
 0x964   :  { %1048 = vmatpush1.msra.mxu0 %v1596_v27 }
 0x9b7   :  { %v863_v59 = vpop.permute.xlu0 %862 }
 0xa15   :  { %v841_v32 = vpop.f32.mrf.mxu0 }
 0xa16   :  { %v846_v41 = vadd.f32 %v841_v32, %v770_v1 }
 0xa17   :  { %v843_v44 = vpop.f32.mrf.mxu0 }
 0xa18   :  { %v847_v8 = vadd.f32 %v843_v44, %v771_v5  ;;  %v1286_v55 = vmul.f32 -1.442695, %v846_v41 }
 0xa1a   :  { %1358 = vtanh.f32 %v847_v8  ;;  %v1287_v62 = vmul.f32 -1.442695, %v847_v8 }
 0xa1b   :  { %1360 = vpow2.f32 %v1286_v55 }
 0xa27   :  { %v1359_v2 = vpop.eup %1358 }
 0xa28   :  { %867 = vrot.lane.b32.xlu1 %v1359_v2, %s1501_s12  ;;  %v1361_v34 = vpop.eup %1360 }
 0xa29   :  { %v854_v28 = vadd.f32 1.0, %v1361_v34 }
 0xa2b   :  { %1362 = vrcp.f32 %v854_v28 }
 0xa38   :  { %v1363_v63 = vpop.eup %1362 }
 0xa39   :  { %v865_v1 = vmul.f32 %v1363_v63, %v863_v59 }
 0xa9a   :  { %v868_v49 = vpop.permute.xlu1 %867 }
 0xa9b   :  { %v870_v54 = vmul.f32 %v1363_v63, %v868_v49 }
 0xa9d   :  { %872 = vrot.lane.b32.xlu1 %v870_v54, %s1501_s12 }
 0xb0f   :  { %v873_v57 = vpop.permute.xlu1 %872 }
 0xb10   :  { %v875_v53 = vadd.f32 %v873_v57, %v865_v1 }
 0xb12   :  { %1364 = vtanh.f32 %v875_v53  ;;  %887 = vrot.lane.b32.xlu1 %v875_v53, %s1501_s12 }
 0xb13   :  { %1366 = vpow2.f32 %v1287_v62 }
 0xb1f   :  { %v1365_v56 = vpop.eup %1364 }
 0xb20   :  { %878 = vrot.lane.b32.xlu0 %v1365_v56, %s1501_s12  ;;  %v1367_v5 = vpop.eup %1366 }
 0xb21   :  { %v855_v4 = vadd.f32 1.0, %v1367_v5 }
 0xb23   :  { %1368 = vrcp.f32 %v855_v4 }
 0xb30   :  { %v1369_v43 = vpop.eup %1368 }
 0xb84   :  { %v888_v60 = vpop.permute.xlu1 %887 }
 0xb85   :  { %v890_v37 = vsel %vm884_vm12, %v888_v60, %v769_v30 }
 0xb86   :  { %983 = vrot.lane.b32.xlu1 %v890_v37, %s1501_s12 }
 0xb92   :  { %v879_v38 = vpop.permute.xlu0 %878 }
 0xb93   :  { %v881_v36 = vmul.f32 %v1369_v43, %v879_v38 }
 0xb95   :  { %v885_v42 = vsel %vm884_vm12, %v881_v36, %v764_v11  ;;  %v1999_v36 = vsel %vm1675_vm10, %v1739_v46, %v1745_v48  ;;  %vm1246_vm10 = vcmp.gt.s32.totalorder %v1772_v18, 7 }
 0xb96   :  { %1288 = vmatmul.mubr.msk.f32.vlgmr.msra.gmra.mxu1 %vm291_vm14, %v885_v42 }
 0xb97   :  { %1155 = vmatpush1.msra.mxu1 %v1546_v9  ;;  %1202 = vmatprep.mubr.f32.mxu1 %v1499_v0 }
 0xb98   :  { %1156 = vmatprep.subr.mxu1 %v1548_v10 }
 0xb99   :  { %1157 = vmatpush1.msra.mxu1 %v1551_v12 }
 0xb9a   :  { %1158 = vmatprep.subr.mxu1 %v1554_v14 }
 0xb9b   :  { %1159 = vmatpush1.msra.mxu1 %v1557_v15 }
 0xb9c   :  { %1160 = vmatprep.subr.mxu1 %v1560_v16 }
 0xb9d   :  { %1161 = vmatpush1.msra.mxu1 %v1564_v17 }
 0xb9e   :  { %1162 = vmatprep.subr.mxu1 %v1568_v19 }
 0xb9f   :  { %1163 = vmatpush1.msra.mxu1 %v1571_v20 }
 0xba0   :  { %1164 = vmatprep.subr.mxu1 %v1575_v21 }
 0xba1   :  { %1165 = vmatpush1.msra.mxu1 %v1580_v22 }
 0xba2   :  { %1166 = vmatprep.subr.mxu1 %v1584_v24 }
 0xba3   :  { %1167 = vmatpush1.msra.mxu1 %v1587_v25 }
 0xba4   :  { %1168 = vmatprep.subr.mxu1 %v1591_v26 }
 0xba5   :  { %1169 = vmatpush1.msra.mxu1 %v1596_v27 }
 0xbf8   :  { %v984_v22 = vpop.permute.xlu1 %983 }
 0xc56   :  { %v962_v0 = vpop.f32.mrf.mxu1 }
 0xc57   :  { %v967_v9 = vadd.f32 %v962_v0, %v891_v13 }
 0xc58   :  { %v964_v10 = vpop.f32.mrf.mxu1 }
 0xc59   :  { %v968_v12 = vadd.f32 %v964_v10, %v892_v29  ;;  %v1289_v15 = vmul.f32 -1.442695, %v967_v9 }
 0xc5b   :  { %1370 = vtanh.f32 %v968_v12  ;;  %v1290_v50 = vmul.f32 -1.442695, %v968_v12 }
 0xc5c   :  { %1372 = vpow2.f32 %v1289_v15 }
 0xc68   :  { %v1371_v14 = vpop.eup %1370 }
 0xc69   :  { %988 = vrot.lane.b32.xlu0 %v1371_v14, %s1501_s12  ;;  %v1373_v16 = vpop.eup %1372 }
 0xc6a   :  { %v975_v17 = vadd.f32 1.0, %v1373_v16 }
 0xc6c   :  { %1374 = vrcp.f32 %v975_v17 }
 0xc79   :  { %v1375_v19 = vpop.eup %1374 }
 0xc7a   :  { %v986_v24 = vmul.f32 %v1375_v19, %v984_v22 }
 0xcdb   :  { %v989_v20 = vpop.permute.xlu0 %988 }
 0xcdc   :  { %v991_v21 = vmul.f32 %v1375_v19, %v989_v20 }
 0xcde   :  { %993 = vrot.lane.b32.xlu0 %v991_v21, %s1501_s12 }
 0xd50   :  { %v994_v25 = vpop.permute.xlu0 %993 }
 0xd51   :  { %v996_v26 = vadd.f32 %v994_v25, %v986_v24 }
 0xd53   :  { %1376 = vtanh.f32 %v996_v26  ;;  %1008 = vrot.lane.b32.xlu0 %v996_v26, %s1501_s12 }
 0xd54   :  { %1378 = vpow2.f32 %v1290_v50 }
 0xd60   :  { %v1377_v27 = vpop.eup %1376 }
 0xd61   :  { %999 = vrot.lane.b32.xlu1 %v1377_v27, %s1501_s12  ;;  %v1379_v52 = vpop.eup %1378 }
 0xd62   :  { %v976_v3 = vadd.f32 1.0, %v1379_v52 }
 0xd64   :  { %1380 = vrcp.f32 %v976_v3 }
 0xd71   :  { %v1381_v29 = vpop.eup %1380 }
 0xdc5   :  { %v1009_v7 = vpop.permute.xlu0 %1008 }
 0xdc6   :  { %v1011_v13 = vsel %vm1005_vm0, %v1009_v7, %v890_v37  ;;  %v1998_v37 = vsel %vm1669_vm9, %v1647_v39, %v1729_v35  ;;  %vm1245_vm9 = vcmp.le.s32.totalorder %v1768_v6, 7 }
 0xdc7   :  { %1104 = vrot.lane.b32.xlu0 %v1011_v13, %s1501_s12  ;;  %vm1247_vm4 = vmand %vm1245_vm9, %vm1246_vm10 }
 0xdd3   :  { %v1000_v30 = vpop.permute.xlu1 %999 }
 0xdd4   :  { %v1002_v51 = vmul.f32 %v1381_v29, %v1000_v30 }
 0xdd6   :  { %v1006_v11 = vsel %vm1005_vm0, %v1002_v51, %v885_v42 }
 0xdd7   :  { %1291 = vmatmul.mubr.msk.f32.vlgmr.msra.gmra.mxu0 %vm291_vm14, %v1006_v11 }
 0xe39   :  { %v1105_v23 = vpop.permute.xlu0 %1104 }
 0xe97   :  { %v1083_v32 = vpop.f32.mrf.mxu0 }
 0xe98   :  { %v1088_v41 = vadd.f32 %v1083_v32, %v1012_v33 }
 0xe99   :  { %v1085_v44 = vpop.f32.mrf.mxu0 }
 0xe9a   :  { %v1089_v8 = vadd.f32 %v1085_v44, %v1013_v40  ;;  %v1292_v55 = vmul.f32 -1.442695, %v1088_v41 }
 0xe9c   :  { %1382 = vtanh.f32 %v1089_v8  ;;  %v1293_v31 = vmul.f32 -1.442695, %v1089_v8 }
 0xe9d   :  { %1384 = vpow2.f32 %v1292_v55 }
 0xea9   :  { %v1383_v2 = vpop.eup %1382 }
 0xeaa   :  { %1109 = vrot.lane.b32.xlu1 %v1383_v2, %s1501_s12  ;;  %v1385_v34 = vpop.eup %1384 }
 0xeab   :  { %v1096_v28 = vadd.f32 1.0, %v1385_v34 }
 0xead   :  { %1386 = vrcp.f32 %v1096_v28 }
 0xeba   :  { %v1387_v63 = vpop.eup %1386 }
 0xebb   :  { %v1107_v33 = vmul.f32 %v1387_v63, %v1105_v23 }
 0xf1c   :  { %v1110_v49 = vpop.permute.xlu1 %1109 }
 0xf1d   :  { %v1112_v45 = vmul.f32 %v1387_v63, %v1110_v49 }
 0xf1f   :  { %1114 = vrot.lane.b32.xlu1 %v1112_v45, %s1501_s12 }
 0xf91   :  { %v1115_v54 = vpop.permute.xlu1 %1114 }
 0xf92   :  { %v1117_v59 = vadd.f32 %v1115_v54, %v1107_v33 }
 0xf94   :  { %1388 = vtanh.f32 %v1117_v59  ;;  %1129 = vrot.lane.b32.xlu1 %v1117_v59, %s1501_s12 }
 0xf95   :  { %1390 = vpow2.f32 %v1293_v31 }
 0xfa1   :  { %v1389_v47 = vpop.eup %1388 }
 0xfa2   :  { %1120 = vrot.lane.b32.xlu0 %v1389_v47, %s1501_s12  ;;  %v1391_v40 = vpop.eup %1390 }
 0xfa3   :  { %v1097_v1 = vadd.f32 1.0, %v1391_v40 }
 0xfa5   :  { %1392 = vrcp.f32 %v1097_v1 }
 0xfb2   :  { %v1393_v56 = vpop.eup %1392 }
0x1006   :  { %v1130_v57 = vpop.permute.xlu1 %1129 }
0x1007   :  { %v1132_v53 = vsel %vm1126_vm3, %v1130_v57, %v1011_v13 }
0x1008   :  { %1225 = vrot.lane.b32.xlu1 %v1132_v53, %s1501_s12 }
0x1014   :  { %v1121_v62 = vpop.permute.xlu0 %1120 }
0x1015   :  { %v1123_v5 = vmul.f32 %v1393_v56, %v1121_v62 }
0x1017   :  { %v1127_v4 = vsel %vm1126_vm3, %v1123_v5, %v1006_v11 }
0x1018   :  { %1294 = vmatmul.mubr.msk.f32.vlgmr.msra.gmra.mxu1 %vm291_vm14, %v1127_v4 }
0x107a   :  { %v1226_v35 = vpop.permute.xlu1 %1225 }
0x10d8   :  { %v1204_v60 = vpop.f32.mrf.mxu1 }
0x10d9   :  { %v1209_v43 = vadd.f32 %v1204_v60, %v1998_v37 }
0x10da   :  { %v1206_v38 = vpop.f32.mrf.mxu1 }
0x10db   :  { %v1210_v42 = vadd.f32 %v1206_v38, %v1999_v36  ;;  %v1295_v9 = vmul.f32 -1.442695, %v1209_v43 }
0x10dd   :  { %1394 = vtanh.f32 %v1210_v42  ;;  %v1296_v48 = vmul.f32 -1.442695, %v1210_v42 }
0x10de   :  { %1396 = vpow2.f32 %v1295_v9 }
0x10ea   :  { %v1395_v0 = vpop.eup %1394 }
0x10eb   :  { %1230 = vrot.lane.b32.xlu0 %v1395_v0, %s1501_s12  ;;  %v1397_v10 = vpop.eup %1396 }
0x10ec   :  { %v1217_v12 = vadd.f32 1.0, %v1397_v10 }
0x10ee   :  { %1398 = vrcp.f32 %v1217_v12 }
0x10fb   :  { %v1399_v58 = vpop.eup %1398 }
0x10fc   :  { %v1228_v61 = vmul.f32 %v1399_v58, %v1226_v35 }
0x115d   :  { %v1231_v14 = vpop.permute.xlu0 %1230 }
0x115e   :  { %v1233_v39 = vmul.f32 %v1399_v58, %v1231_v14 }
0x1160   :  { %1235 = vrot.lane.b32.xlu0 %v1233_v39, %s1501_s12 }
0x11d2   :  { %v1236_v15 = vpop.permute.xlu0 %1235 }
0x11d3   :  { %v1238_v16 = vadd.f32 %v1236_v15, %v1228_v61 }
0x11d5   :  { %1400 = vtanh.f32 %v1238_v16 }
0x11d6   :  { %1402 = vpow2.f32 %v1296_v48 }
0x11e2   :  { %v1401_v46 = vpop.eup %1400 }
0x11e3   :  { %1241 = vrot.lane.b32.xlu1 %v1401_v46, %s1501_s12  ;;  %v1403_v17 = vpop.eup %1402 }
0x11e4   :  { %v1218_v19 = vadd.f32 1.0, %v1403_v17 }
0x11e6   :  { %1404 = vrcp.f32 %v1218_v19 }
0x11f3   :  { %v1405_v20 = vpop.eup %1404 }
0x1255   :  { %v1242_v21 = vpop.permute.xlu1 %1241 }
0x1256   :  { %v1244_v22 = vmul.f32 %v1405_v20, %v1242_v21 }
0x1258   :  { %v1248_v24 = vsel %vm1247_vm4, %v1244_v22, %v1127_v4 }
0x1259   :  { %1249 = vst.msk [vmem:[#allocation8] sm:$0xff] %vm291_vm14, %v1248_v24 }
0x125a   :  { %1477 = shalt.err (!%p1474_p5)
}
0x125b   :  { %1259 = dma.vmem_to_hbm [thread:$0]  %s1257_s13, 128, %s1993_s5, [#allocation4]  }
0x125c   :  { %1490 = dma.done.wait [#allocation4], 128  }
0x125d   :  { %1491 = vsyncadd [#allocation4], 4294967168 }
0x125e   :  { %1263 = vsyncpa [#allocation3], 1 }
0x125f   :  { %1264 = vsyncpa [#allocation6], 1 }
0x1260   :  { %1265 = vsyncpa [#allocation4], 1 }

</bundles_post_ra>
